<compile_context>
chip_gen: v7x
topology: tpu7x:2x2x1
jax: 0.10.0
libtpu: 0.0.40
codegen_flags: <defaults>
</compile_context>

<pallas_src>
import functools

import jax
import jax.numpy as jnp
import numpy as np
from jax import lax
from jax.experimental import pallas as pl
from jax.experimental.pallas import tpu as pltpu


def _round_up(x, m):
    return (x + m - 1) // m * m


def _pick_chunk(s, max_chunk):
    # Largest chunk <= max_chunk that divides S exactly (no padded timesteps,
    # which would change LSTM semantics).
    for ts in range(min(s, max_chunk), 0, -1):
        if s % ts == 0:
            return ts
    return 1


def _lstm_disc_kernel(x_ref, wih_ref, whh_ref, b_ref, wlin_ref, blin_ref,
                      vote_ref, hn_ref, cn_ref,
                      gx_ref, h_ref, c_ref, hsum_ref,
                      *, ts, tb, hp, inv_s):
    """Grid = (batch_tiles [parallel], seq_chunks [arbitrary]).

    x_ref:    (1, 1, ts*tb, E) bf16 — chunk of embedded tokens, time-major rows
    wih_ref:  (E, 4*hp) bf16, whh_ref: (hp, 4*hp) bf16  (gate-padded, per-gate slabs)
    b_ref:    (1, 4*hp) f32 fused bias; wlin_ref: (hp, 1) f32; blin_ref: (1, 1) f32
    scratch:  gx (ts*tb, 4*hp) f32, h/c/hsum (tb, hp) f32 carried across chunks
    """
    s_idx = pl.program_id(1)

    # ---- per-batch-tile carry init -------------------------------------
    @pl.when(s_idx == 0)
    def _():
        h_ref[...] = jnp.zeros_like(h_ref)
        c_ref[...] = jnp.zeros_like(c_ref)
        hsum_ref[...] = jnp.zeros_like(hsum_ref)

    # ---- hoisted input projection for this chunk: one big MXU matmul ----
    x2d = x_ref[0, 0]                                         # (ts*tb, E) bf16
    gx_ref[...] = (
        jnp.dot(x2d, wih_ref[...], preferred_element_type=jnp.float32)
        + b_ref[...]                                          # fused b_ih + b_hh
    )                                                         # (ts*tb, 4*hp) f32

    whh = whh_ref[...]                                        # (hp, 4*hp) bf16

    # ---- serial recurrence: only h @ W_hh^T + elementwise per step ------
    def step(t, carry):
        h, c, hsum = carry
        row = pl.multiple_of(t * tb, tb)
        gates = gx_ref[pl.ds(row, tb), :] + jnp.dot(
            h.astype(jnp.bfloat16), whh, preferred_element_type=jnp.float32)
        # PyTorch gate order i, f, g, o; each slab is lane-aligned (hp % 128 == 0)
        i_g = jax.nn.sigmoid(gates[:, 0 * hp:1 * hp])
        f_g = jax.nn.sigmoid(gates[:, 1 * hp:2 * hp])
        g_g = jnp.tanh(gates[:, 2 * hp:3 * hp])
        o_g = jax.nn.sigmoid(gates[:, 3 * hp:4 * hp])
        c_new = f_g * c + i_g * g_g
        h_new = o_g * jnp.tanh(c_new)
        return h_new, c_new, hsum + h_new

    h, c, hsum = lax.fori_loop(
        0, ts, step, (h_ref[...], c_ref[...], hsum_ref[...]), unroll=True)
    h_ref[...] = h
    c_ref[...] = c
    hsum_ref[...] = hsum

    # ---- epilogue: affine head applied once to the mean hidden state ----
    @pl.when(s_idx == pl.num_programs(1) - 1)
    def _():
        h_mean = hsum * jnp.float32(inv_s)
        vote_ref[...] = (
            jnp.dot(h_mean, wlin_ref[...], preferred_element_type=jnp.float32)
            + blin_ref[...]
        )
        hn_ref[...] = h
        cn_ref[...] = c


def lstm_discriminator_forward(tokens, params, *, max_chunk=16, max_batch_tile=32):
    """tokens: (B, S) int32. Returns (vote (B,1), (h_n (1,B,H), c_n (1,B,H)))."""
    B, S = tokens.shape
    if S == 0:
        raise ValueError("sequence length must be > 0")
    E = params["w_ih"].shape[1]
    H = params["w_hh"].shape[1]

    Hp = _round_up(H, 128)                 # lane-aligned per-gate hidden width
    TB = min(max_batch_tile, _round_up(B, 8))
    Bp = _round_up(B, TB)                  # padded batch (multiple of 8 sublanes)
    nb = Bp // TB
    ts = _pick_chunk(S, max_chunk)         # sequence chunk (divides S exactly)
    ns = S // ts

    f32, bf16 = jnp.float32, jnp.bfloat16

    # --- pack weights: gate g occupies lane-aligned columns [g*Hp, g*Hp+H) ---
    def pack_gate_cols(w):                                   # (4H, K) -> (K, 4*Hp)
        K = w.shape[1]
        w4 = jnp.transpose(w.astype(f32).reshape(4, H, K), (0, 2, 1))   # (4, K, H)
        out = jnp.zeros((4, K, Hp), f32).at[:, :, :H].set(w4)
        return jnp.transpose(out, (1, 0, 2)).reshape(K, 4 * Hp)

    wih_p = pack_gate_cols(params["w_ih"]).astype(bf16)                 # (E, 4Hp)
    whh_p = (jnp.zeros((Hp, 4 * Hp), f32)
             .at[:H, :].set(pack_gate_cols(params["w_hh"]))).astype(bf16)  # (Hp, 4Hp)
    b_p = (jnp.zeros((4, Hp), f32)
           .at[:, :H].set((params["b_ih"] + params["b_hh"]).astype(f32).reshape(4, H))
           ).reshape(1, 4 * Hp)                                         # (1, 4Hp)
    wlin_p = jnp.zeros((Hp, 1), f32).at[:H, :].set(params["w_lin"].astype(f32).T)
    blin_p = params["b_lin"].astype(f32).reshape(1, 1)

    # --- gather embeddings directly into the blocked, time-major layout ---
    # row (t*TB + r) of block (b_tile, s_chunk) == batch row r, time s_chunk*ts + t
    tok = jnp.zeros((Bp, S), jnp.int32).at[:B].set(tokens)
    tok = tok.reshape(nb, TB, ns, ts).transpose(0, 2, 3, 1).reshape(nb, ns, ts * TB)
    x = params["embedding"].astype(bf16)[tok]                # (nb, ns, ts*TB, E)
    # TODO(synk): for very large vocab/seq, move the gather into the kernel via
    # scalar-prefetched token ids + manual DMA instead of this XLA gather.

    kernel = functools.partial(_lstm_disc_kernel, ts=ts, tb=TB, hp=Hp, inv_s=1.0 / S)

    vote, h_n, c_n = pl.pallas_call(
        kernel,
        out_shape=(
            jax.ShapeDtypeStruct((Bp, 1), f32),
            jax.ShapeDtypeStruct((Bp, Hp), f32),
            jax.ShapeDtypeStruct((Bp, Hp), f32),
        ),
        grid=(nb, ns),
        in_specs=[
            pl.BlockSpec((1, 1, ts * TB, E), lambda b, s: (b, s, 0, 0)),   # x chunk
            pl.BlockSpec((E, 4 * Hp), lambda b, s: (0, 0)),                # W_ih^T
            pl.BlockSpec((Hp, 4 * Hp), lambda b, s: (0, 0)),               # W_hh^T
            pl.BlockSpec((1, 4 * Hp), lambda b, s: (0, 0)),                # bias
            pl.BlockSpec((Hp, 1), lambda b, s: (0, 0)),                    # W_lin^T
            pl.BlockSpec((1, 1), lambda b, s: (0, 0)),                     # b_lin
        ],
        out_specs=(
            pl.BlockSpec((TB, 1), lambda b, s: (b, 0)),
            pl.BlockSpec((TB, Hp), lambda b, s: (b, 0)),
            pl.BlockSpec((TB, Hp), lambda b, s: (b, 0)),
        ),
        scratch_shapes=[
            pltpu.VMEM((ts * TB, 4 * Hp), f32),   # hoisted input-projection gates
            pltpu.VMEM((TB, Hp), f32),            # h carry (across seq chunks)
            pltpu.VMEM((TB, Hp), f32),            # c carry
            pltpu.VMEM((TB, Hp), f32),            # sum_t h_t
        ],
        compiler_params=pltpu.CompilerParams(
            dimension_semantics=("parallel", "arbitrary"),
            vmem_limit_bytes=64 * 1024 * 1024,
        ),
    )(x, wih_p, whh_p, b_p, wlin_p, blin_p)

    vote = vote[:B]
    h_n = h_n[:B, :H].reshape(1, B, H)
    c_n = c_n[:B, :H].reshape(1, B, H)
    return vote, (h_n, c_n)


def lstm_discriminator_reference(tokens, params):
    """Pure-JAX f32 reference matching PyTorch semantics (for validation)."""
    B, _ = tokens.shape
    H = params["w_hh"].shape[1]
    emb = params["embedding"][tokens].astype(jnp.float32)            # (B,S,E)
    w_ih, w_hh = params["w_ih"], params["w_hh"]
    b = params["b_ih"] + params["b_hh"]

    def step(carry, x_t):
        h, c = carry
        gates = x_t @ w_ih.T + h @ w_hh.T + b
        i = jax.nn.sigmoid(gates[:, 0:H])
        f = jax.nn.sigmoid(gates[:, H:2 * H])
        g = jnp.tanh(gates[:, 2 * H:3 * H])
        o = jax.nn.sigmoid(gates[:, 3 * H:4 * H])
        c = f * c + i * g
        h = o * jnp.tanh(c)
        return (h, c), h

    init = (jnp.zeros((B, H), jnp.float32), jnp.zeros((B, H), jnp.float32))
    (h, c), hs = lax.scan(step, init, jnp.transpose(emb, (1, 0, 2)))
    y = hs @ params["w_lin"].T + params["b_lin"]                     # (S,B,1)
    return jnp.mean(y, axis=0), (h[None], c[None])


def init_params(key, vocab_size, n_features, hidden_size):
    k_emb, k_wih, k_whh, k_bih, k_bhh, k_wl, k_bl = jax.random.split(key, 7)
    scale = 1.0 / jnp.sqrt(hidden_size)
    return {
        "embedding": jax.random.normal(k_emb, (vocab_size, n_features), jnp.float32),
        "w_ih": jax.random.uniform(k_wih, (4 * hidden_size, n_features),
                                   jnp.float32, -scale, scale),
        "w_hh": jax.random.uniform(k_whh, (4 * hidden_size, hidden_size),
                                   jnp.float32, -scale, scale),
        "b_ih": jax.random.uniform(k_bih, (4 * hidden_size,), jnp.float32, -scale, scale),
        "b_hh": jax.random.uniform(k_bhh, (4 * hidden_size,), jnp.float32, -scale, scale),
        "w_lin": jax.random.uniform(k_wl, (1, hidden_size), jnp.float32, -scale, scale),
        "b_lin": jax.random.uniform(k_bl, (1,), jnp.float32, -scale, scale),
    }


if __name__ == "__main__":
    B, S = 2, 8           # batch, sequence length
    VOCAB = 32
    E = 16                # LSTM input_size (embedding dim)
    H = 32                # LSTM hidden_size (unidirectional -> D = 1)

    key = jax.random.PRNGKey(0)
    k_params, k_tok = jax.random.split(key)
    params = init_params(k_params, VOCAB, E, H)
    tokens = jax.random.randint(k_tok, (B, S), 0, VOCAB, dtype=jnp.int32)

    vote, (h_n, c_n) = jax.jit(lstm_discriminator_forward)(tokens, params)
    jax.block_until_ready((vote, h_n, c_n))

    assert vote.shape == (B, 1)
    assert h_n.shape == (1, B, H) and c_n.shape == (1, B, H)

    # Validate against the f32 pure-JAX reference (bf16 MXU inputs -> loose tol).
    vote_r, (hn_r, cn_r) = lstm_discriminator_reference(tokens, params)
    np.testing.assert_allclose(np.asarray(vote), np.asarray(vote_r), atol=5e-2, rtol=5e-2)
    np.testing.assert_allclose(np.asarray(h_n), np.asarray(hn_r), atol=5e-2, rtol=5e-2)
    np.testing.assert_allclose(np.asarray(c_n), np.asarray(cn_r), atol=5e-2, rtol=5e-2)

    print("KERNEL_OK")
</pallas_src>

<mosaic_0001>
module attributes {stable_mosaic.version = 11 : i64} {
  func.func @_lstm_disc_kernel(%arg0: i32, %arg1: i32, %arg2: memref<1x1x64x16xbf16, #tpu.memory_space<vmem>>, %arg3: memref<16x512xbf16, #tpu.memory_space<vmem>>, %arg4: memref<128x512xbf16, #tpu.memory_space<vmem>>, %arg5: memref<1x512xf32, #tpu.memory_space<vmem>>, %arg6: memref<128x1xf32, #tpu.memory_space<vmem>>, %arg7: memref<1x1xf32, #tpu.memory_space<vmem>>, %arg8: memref<8x1xf32, #tpu.memory_space<vmem>>, %arg9: memref<8x128xf32, #tpu.memory_space<vmem>>, %arg10: memref<8x128xf32, #tpu.memory_space<vmem>>, %arg11: memref<64x512xf32, #tpu.memory_space<vmem>>, %arg12: memref<8x128xf32, #tpu.memory_space<vmem>>, %arg13: memref<8x128xf32, #tpu.memory_space<vmem>>, %arg14: memref<8x128xf32, #tpu.memory_space<vmem>>) attributes {dimension_semantics = [#tpu.dimension_semantics<parallel>, #tpu.dimension_semantics<arbitrary>], iteration_bounds = array<i64: 1, 1>, scalar_prefetch = 0 : i64, scratch_operands = 4 : i64, tpu.core_type = #tpu.core_type<tc>, window_params = [{transform_indices = @transform_0, window_bounds = array<i64: 1, 1, 64, 16>}, {pipeline_mode = #tpu.pipeline_mode<synchronous>, transform_indices = @transform_1, window_bounds = array<i64: 16, 512>}, {pipeline_mode = #tpu.pipeline_mode<synchronous>, transform_indices = @transform_2, window_bounds = array<i64: 128, 512>}, {pipeline_mode = #tpu.pipeline_mode<synchronous>, transform_indices = @transform_3, window_bounds = array<i64: 1, 512>}, {pipeline_mode = #tpu.pipeline_mode<synchronous>, transform_indices = @transform_4, window_bounds = array<i64: 128, 1>}, {pipeline_mode = #tpu.pipeline_mode<synchronous>, transform_indices = @transform_5, window_bounds = array<i64: 1, 1>}, {transform_indices = @transform_6, window_bounds = array<i64: 8, 1>}, {transform_indices = @transform_7, window_bounds = array<i64: 8, 128>}, {transform_indices = @transform_8, window_bounds = array<i64: 8, 128>}]} {
    %c0_i32 = arith.constant 0 : i32
    %0 = arith.cmpi eq, %arg1, %c0_i32 : i32
    %1 = arith.extui %0 : i1 to i32
    %c0_i32_0 = arith.constant 0 : i32
    %2 = arith.cmpi ne, %1, %c0_i32_0 : i32
    scf.if %2 {
      %cst_75 = arith.constant 0.000000e+00 : f32
      %285 = vector.broadcast %cst_75 : f32 to vector<8x128xf32>
      %c0_76 = arith.constant 0 : index
      %c0_77 = arith.constant 0 : index
      %286 = vector.load %arg12[%c0_76, %c0_77] : memref<8x128xf32, #tpu.memory_space<vmem>>, vector<8x128xf32>
      tpu.vector_store %arg12[%c0_76, %c0_77], %285 {strides = array<i32>} : memref<8x128xf32, #tpu.memory_space<vmem>>, vector<8x128xf32>,
      %cst_78 = arith.constant 0.000000e+00 : f32
      %287 = vector.broadcast %cst_78 : f32 to vector<8x128xf32>
      %c0_79 = arith.constant 0 : index
      %c0_80 = arith.constant 0 : index
      %288 = vector.load %arg13[%c0_79, %c0_80] : memref<8x128xf32, #tpu.memory_space<vmem>>, vector<8x128xf32>
      tpu.vector_store %arg13[%c0_79, %c0_80], %287 {strides = array<i32>} : memref<8x128xf32, #tpu.memory_space<vmem>>, vector<8x128xf32>,
      %cst_81 = arith.constant 0.000000e+00 : f32
      %289 = vector.broadcast %cst_81 : f32 to vector<8x128xf32>
      %c0_82 = arith.constant 0 : index
      %c0_83 = arith.constant 0 : index
      %290 = vector.load %arg14[%c0_82, %c0_83] : memref<8x128xf32, #tpu.memory_space<vmem>>, vector<8x128xf32>
      tpu.vector_store %arg14[%c0_82, %c0_83], %289 {strides = array<i32>} : memref<8x128xf32, #tpu.memory_space<vmem>>, vector<8x128xf32>,
    } else {
    }
    %c0 = arith.constant 0 : index
    %c0_1 = arith.constant 0 : index
    %c0_2 = arith.constant 0 : index
    %c0_3 = arith.constant 0 : index
    %3 = vector.load %arg2[%c0, %c0_1, %c0_2, %c0_3] : memref<1x1x64x16xbf16, #tpu.memory_space<vmem>>, vector<1x1x64x16xbf16>
    %4 = vector.shape_cast %3 : vector<1x1x64x16xbf16> to vector<64x16xbf16>
    %c0_4 = arith.constant 0 : index
    %c0_5 = arith.constant 0 : index
    %5 = vector.load %arg3[%c0_4, %c0_5] : memref<16x512xbf16, #tpu.memory_space<vmem>>, vector<16x512xbf16>
    %cst = arith.constant dense<0.000000e+00> : vector<64x512xf32>
    %6 = tpu.matmul %4, %5, %cst {dimension_numbers = #tpu.dot_dimension_numbers<[1], [0], [0], [1], [0, 0, 1, 1], [], []>} : vector<64x16xbf16>, vector<16x512xbf16>, vector<64x512xf32> -> vector<64x512xf32>
    %c0_6 = arith.constant 0 : index
    %c0_7 = arith.constant 0 : index
    %7 = vector.load %arg5[%c0_6, %c0_7] : memref<1x512xf32, #tpu.memory_space<vmem>>, vector<1x512xf32>
    %8 = vector.broadcast %7 : vector<1x512xf32> to vector<64x512xf32>
    %9 = arith.addf %6, %8 : vector<64x512xf32>
    %c0_8 = arith.constant 0 : index
    %c0_9 = arith.constant 0 : index
    %10 = vector.load %arg11[%c0_8, %c0_9] : memref<64x512xf32, #tpu.memory_space<vmem>>, vector<64x512xf32>
    tpu.vector_store %arg11[%c0_8, %c0_9], %9 {strides = array<i32>} : memref<64x512xf32, #tpu.memory_space<vmem>>, vector<64x512xf32>,
    %c0_10 = arith.constant 0 : index
    %c0_11 = arith.constant 0 : index
    %11 = vector.load %arg4[%c0_10, %c0_11] : memref<128x512xbf16, #tpu.memory_space<vmem>>, vector<128x512xbf16>
    %c0_12 = arith.constant 0 : index
    %c0_13 = arith.constant 0 : index
    %12 = vector.load %arg12[%c0_12, %c0_13] : memref<8x128xf32, #tpu.memory_space<vmem>>, vector<8x128xf32>
    %c0_14 = arith.constant 0 : index
    %c0_15 = arith.constant 0 : index
    %13 = vector.load %arg13[%c0_14, %c0_15] : memref<8x128xf32, #tpu.memory_space<vmem>>, vector<8x128xf32>
    %c0_16 = arith.constant 0 : index
    %c0_17 = arith.constant 0 : index
    %14 = vector.load %arg14[%c0_16, %c0_17] : memref<8x128xf32, #tpu.memory_space<vmem>>, vector<8x128xf32>
    %c0_i32_18 = arith.constant 0 : i32
    %c8_i32 = arith.constant 8 : i32
    %15 = arith.muli %c0_i32_18, %c8_i32 : i32
    %16 = tpu.assume_multiple %15, 8 : i32
    %17 = arith.index_cast %16 : i32 to index
    %c0_19 = arith.constant 0 : index
    %18 = vector.load %arg11[%17, %c0_19] : memref<64x512xf32, #tpu.memory_space<vmem>>, vector<8x512xf32>
    %19 = arith.truncf %12 : vector<8x128xf32> to vector<8x128xbf16>
    %cst_20 = arith.constant dense<0.000000e+00> : vector<8x512xf32>
    %20 = tpu.matmul %19, %11, %cst_20 {dimension_numbers = #tpu.dot_dimension_numbers<[1], [0], [0], [1], [0, 0, 1, 1], [], []>} : vector<8x128xbf16>, vector<128x512xbf16>, vector<8x512xf32> -> vector<8x512xf32>
    %21 = arith.addf %18, %20 : vector<8x512xf32>
    %22 = vector.extract_strided_slice %21 {offsets = [0, 0], sizes = [8, 128], strides = [1, 1]} : vector<8x512xf32> to vector<8x128xf32>
    %23 = arith.negf %22 : vector<8x128xf32>
    %24 = math.exp %23 : vector<8x128xf32>
    %cst_21 = arith.constant 1.000000e+00 : f32
    %25 = vector.broadcast %cst_21 : f32 to vector<8x128xf32>
    %26 = arith.addf %25, %24 : vector<8x128xf32>
    %27 = arith.divf %25, %26 : vector<8x128xf32>
    %28 = vector.extract_strided_slice %21 {offsets = [0, 128], sizes = [8, 128], strides = [1, 1]} : vector<8x512xf32> to vector<8x128xf32>
    %29 = arith.negf %28 : vector<8x128xf32>
    %30 = math.exp %29 : vector<8x128xf32>
    %cst_22 = arith.constant 1.000000e+00 : f32
    %31 = vector.broadcast %cst_22 : f32 to vector<8x128xf32>
    %32 = arith.addf %31, %30 : vector<8x128xf32>
    %33 = arith.divf %31, %32 : vector<8x128xf32>
    %34 = vector.extract_strided_slice %21 {offsets = [0, 256], sizes = [8, 128], strides = [1, 1]} : vector<8x512xf32> to vector<8x128xf32>
    %35 = math.tanh %34 : vector<8x128xf32>
    %36 = vector.extract_strided_slice %21 {offsets = [0, 384], sizes = [8, 128], strides = [1, 1]} : vector<8x512xf32> to vector<8x128xf32>
    %37 = arith.negf %36 : vector<8x128xf32>
    %38 = math.exp %37 : vector<8x128xf32>
    %cst_23 = arith.constant 1.000000e+00 : f32
    %39 = vector.broadcast %cst_23 : f32 to vector<8x128xf32>
    %40 = arith.addf %39, %38 : vector<8x128xf32>
    %41 = arith.divf %39, %40 : vector<8x128xf32>
    %42 = arith.mulf %33, %13 : vector<8x128xf32>
    %43 = arith.mulf %27, %35 : vector<8x128xf32>
    %44 = arith.addf %42, %43 : vector<8x128xf32>
    %45 = math.tanh %44 : vector<8x128xf32>
    %46 = arith.mulf %41, %45 : vector<8x128xf32>
    %47 = arith.addf %14, %46 : vector<8x128xf32>
    %c1_i32 = arith.constant 1 : i32
    %c8_i32_24 = arith.constant 8 : i32
    %48 = arith.muli %c1_i32, %c8_i32_24 : i32
    %49 = tpu.assume_multiple %48, 8 : i32
    %50 = arith.index_cast %49 : i32 to index
    %c0_25 = arith.constant 0 : index
    %51 = vector.load %arg11[%50, %c0_25] : memref<64x512xf32, #tpu.memory_space<vmem>>, vector<8x512xf32>
    %52 = arith.truncf %46 : vector<8x128xf32> to vector<8x128xbf16>
    %cst_26 = arith.constant dense<0.000000e+00> : vector<8x512xf32>
    %53 = tpu.matmul %52, %11, %cst_26 {dimension_numbers = #tpu.dot_dimension_numbers<[1], [0], [0], [1], [0, 0, 1, 1], [], []>} : vector<8x128xbf16>, vector<128x512xbf16>, vector<8x512xf32> -> vector<8x512xf32>
    %54 = arith.addf %51, %53 : vector<8x512xf32>
    %55 = vector.extract_strided_slice %54 {offsets = [0, 0], sizes = [8, 128], strides = [1, 1]} : vector<8x512xf32> to vector<8x128xf32>
    %56 = arith.negf %55 : vector<8x128xf32>
    %57 = math.exp %56 : vector<8x128xf32>
    %cst_27 = arith.constant 1.000000e+00 : f32
    %58 = vector.broadcast %cst_27 : f32 to vector<8x128xf32>
    %59 = arith.addf %58, %57 : vector<8x128xf32>
    %60 = arith.divf %58, %59 : vector<8x128xf32>
    %61 = vector.extract_strided_slice %54 {offsets = [0, 128], sizes = [8, 128], strides = [1, 1]} : vector<8x512xf32> to vector<8x128xf32>
    %62 = arith.negf %61 : vector<8x128xf32>
    %63 = math.exp %62 : vector<8x128xf32>
    %cst_28 = arith.constant 1.000000e+00 : f32
    %64 = vector.broadcast %cst_28 : f32 to vector<8x128xf32>
    %65 = arith.addf %64, %63 : vector<8x128xf32>
    %66 = arith.divf %64, %65 : vector<8x128xf32>
    %67 = vector.extract_strided_slice %54 {offsets = [0, 256], sizes = [8, 128], strides = [1, 1]} : vector<8x512xf32> to vector<8x128xf32>
    %68 = math.tanh %67 : vector<8x128xf32>
    %69 = vector.extract_strided_slice %54 {offsets = [0, 384], sizes = [8, 128], strides = [1, 1]} : vector<8x512xf32> to vector<8x128xf32>
    %70 = arith.negf %69 : vector<8x128xf32>
    %71 = math.exp %70 : vector<8x128xf32>
    %cst_29 = arith.constant 1.000000e+00 : f32
    %72 = vector.broadcast %cst_29 : f32 to vector<8x128xf32>
    %73 = arith.addf %72, %71 : vector<8x128xf32>
    %74 = arith.divf %72, %73 : vector<8x128xf32>
    %75 = arith.mulf %66, %44 : vector<8x128xf32>
    %76 = arith.mulf %60, %68 : vector<8x128xf32>
    %77 = arith.addf %75, %76 : vector<8x128xf32>
    %78 = math.tanh %77 : vector<8x128xf32>
    %79 = arith.mulf %74, %78 : vector<8x128xf32>
    %80 = arith.addf %47, %79 : vector<8x128xf32>
    %c2_i32 = arith.constant 2 : i32
    %c8_i32_30 = arith.constant 8 : i32
    %81 = arith.muli %c2_i32, %c8_i32_30 : i32
    %82 = tpu.assume_multiple %81, 8 : i32
    %83 = arith.index_cast %82 : i32 to index
    %c0_31 = arith.constant 0 : index
    %84 = vector.load %arg11[%83, %c0_31] : memref<64x512xf32, #tpu.memory_space<vmem>>, vector<8x512xf32>
    %85 = arith.truncf %79 : vector<8x128xf32> to vector<8x128xbf16>
    %cst_32 = arith.constant dense<0.000000e+00> : vector<8x512xf32>
    %86 = tpu.matmul %85, %11, %cst_32 {dimension_numbers = #tpu.dot_dimension_numbers<[1], [0], [0], [1], [0, 0, 1, 1], [], []>} : vector<8x128xbf16>, vector<128x512xbf16>, vector<8x512xf32> -> vector<8x512xf32>
    %87 = arith.addf %84, %86 : vector<8x512xf32>
    %88 = vector.extract_strided_slice %87 {offsets = [0, 0], sizes = [8, 128], strides = [1, 1]} : vector<8x512xf32> to vector<8x128xf32>
    %89 = arith.negf %88 : vector<8x128xf32>
    %90 = math.exp %89 : vector<8x128xf32>
    %cst_33 = arith.constant 1.000000e+00 : f32
    %91 = vector.broadcast %cst_33 : f32 to vector<8x128xf32>
    %92 = arith.addf %91, %90 : vector<8x128xf32>
    %93 = arith.divf %91, %92 : vector<8x128xf32>
    %94 = vector.extract_strided_slice %87 {offsets = [0, 128], sizes = [8, 128], strides = [1, 1]} : vector<8x512xf32> to vector<8x128xf32>
    %95 = arith.negf %94 : vector<8x128xf32>
    %96 = math.exp %95 : vector<8x128xf32>
    %cst_34 = arith.constant 1.000000e+00 : f32
    %97 = vector.broadcast %cst_34 : f32 to vector<8x128xf32>
    %98 = arith.addf %97, %96 : vector<8x128xf32>
    %99 = arith.divf %97, %98 : vector<8x128xf32>
    %100 = vector.extract_strided_slice %87 {offsets = [0, 256], sizes = [8, 128], strides = [1, 1]} : vector<8x512xf32> to vector<8x128xf32>
    %101 = math.tanh %100 : vector<8x128xf32>
    %102 = vector.extract_strided_slice %87 {offsets = [0, 384], sizes = [8, 128], strides = [1, 1]} : vector<8x512xf32> to vector<8x128xf32>
    %103 = arith.negf %102 : vector<8x128xf32>
    %104 = math.exp %103 : vector<8x128xf32>
    %cst_35 = arith.constant 1.000000e+00 : f32
    %105 = vector.broadcast %cst_35 : f32 to vector<8x128xf32>
    %106 = arith.addf %105, %104 : vector<8x128xf32>
    %107 = arith.divf %105, %106 : vector<8x128xf32>
    %108 = arith.mulf %99, %77 : vector<8x128xf32>
    %109 = arith.mulf %93, %101 : vector<8x128xf32>
    %110 = arith.addf %108, %109 : vector<8x128xf32>
    %111 = math.tanh %110 : vector<8x128xf32>
    %112 = arith.mulf %107, %111 : vector<8x128xf32>
    %113 = arith.addf %80, %112 : vector<8x128xf32>
    %c3_i32 = arith.constant 3 : i32
    %c8_i32_36 = arith.constant 8 : i32
    %114 = arith.muli %c3_i32, %c8_i32_36 : i32
    %115 = tpu.assume_multiple %114, 8 : i32
    %116 = arith.index_cast %115 : i32 to index
    %c0_37 = arith.constant 0 : index
    %117 = vector.load %arg11[%116, %c0_37] : memref<64x512xf32, #tpu.memory_space<vmem>>, vector<8x512xf32>
    %118 = arith.truncf %112 : vector<8x128xf32> to vector<8x128xbf16>
    %cst_38 = arith.constant dense<0.000000e+00> : vector<8x512xf32>
    %119 = tpu.matmul %118, %11, %cst_38 {dimension_numbers = #tpu.dot_dimension_numbers<[1], [0], [0], [1], [0, 0, 1, 1], [], []>} : vector<8x128xbf16>, vector<128x512xbf16>, vector<8x512xf32> -> vector<8x512xf32>
    %120 = arith.addf %117, %119 : vector<8x512xf32>
    %121 = vector.extract_strided_slice %120 {offsets = [0, 0], sizes = [8, 128], strides = [1, 1]} : vector<8x512xf32> to vector<8x128xf32>
    %122 = arith.negf %121 : vector<8x128xf32>
    %123 = math.exp %122 : vector<8x128xf32>
    %cst_39 = arith.constant 1.000000e+00 : f32
    %124 = vector.broadcast %cst_39 : f32 to vector<8x128xf32>
    %125 = arith.addf %124, %123 : vector<8x128xf32>
    %126 = arith.divf %124, %125 : vector<8x128xf32>
    %127 = vector.extract_strided_slice %120 {offsets = [0, 128], sizes = [8, 128], strides = [1, 1]} : vector<8x512xf32> to vector<8x128xf32>
    %128 = arith.negf %127 : vector<8x128xf32>
    %129 = math.exp %128 : vector<8x128xf32>
    %cst_40 = arith.constant 1.000000e+00 : f32
    %130 = vector.broadcast %cst_40 : f32 to vector<8x128xf32>
    %131 = arith.addf %130, %129 : vector<8x128xf32>
    %132 = arith.divf %130, %131 : vector<8x128xf32>
    %133 = vector.extract_strided_slice %120 {offsets = [0, 256], sizes = [8, 128], strides = [1, 1]} : vector<8x512xf32> to vector<8x128xf32>
    %134 = math.tanh %133 : vector<8x128xf32>
    %135 = vector.extract_strided_slice %120 {offsets = [0, 384], sizes = [8, 128], strides = [1, 1]} : vector<8x512xf32> to vector<8x128xf32>
    %136 = arith.negf %135 : vector<8x128xf32>
    %137 = math.exp %136 : vector<8x128xf32>
    %cst_41 = arith.constant 1.000000e+00 : f32
    %138 = vector.broadcast %cst_41 : f32 to vector<8x128xf32>
    %139 = arith.addf %138, %137 : vector<8x128xf32>
    %140 = arith.divf %138, %139 : vector<8x128xf32>
    %141 = arith.mulf %132, %110 : vector<8x128xf32>
    %142 = arith.mulf %126, %134 : vector<8x128xf32>
    %143 = arith.addf %141, %142 : vector<8x128xf32>
    %144 = math.tanh %143 : vector<8x128xf32>
    %145 = arith.mulf %140, %144 : vector<8x128xf32>
    %146 = arith.addf %113, %145 : vector<8x128xf32>
    %c4_i32 = arith.constant 4 : i32
    %c8_i32_42 = arith.constant 8 : i32
    %147 = arith.muli %c4_i32, %c8_i32_42 : i32
    %148 = tpu.assume_multiple %147, 8 : i32
    %149 = arith.index_cast %148 : i32 to index
    %c0_43 = arith.constant 0 : index
    %150 = vector.load %arg11[%149, %c0_43] : memref<64x512xf32, #tpu.memory_space<vmem>>, vector<8x512xf32>
    %151 = arith.truncf %145 : vector<8x128xf32> to vector<8x128xbf16>
    %cst_44 = arith.constant dense<0.000000e+00> : vector<8x512xf32>
    %152 = tpu.matmul %151, %11, %cst_44 {dimension_numbers = #tpu.dot_dimension_numbers<[1], [0], [0], [1], [0, 0, 1, 1], [], []>} : vector<8x128xbf16>, vector<128x512xbf16>, vector<8x512xf32> -> vector<8x512xf32>
    %153 = arith.addf %150, %152 : vector<8x512xf32>
    %154 = vector.extract_strided_slice %153 {offsets = [0, 0], sizes = [8, 128], strides = [1, 1]} : vector<8x512xf32> to vector<8x128xf32>
    %155 = arith.negf %154 : vector<8x128xf32>
    %156 = math.exp %155 : vector<8x128xf32>
    %cst_45 = arith.constant 1.000000e+00 : f32
    %157 = vector.broadcast %cst_45 : f32 to vector<8x128xf32>
    %158 = arith.addf %157, %156 : vector<8x128xf32>
    %159 = arith.divf %157, %158 : vector<8x128xf32>
    %160 = vector.extract_strided_slice %153 {offsets = [0, 128], sizes = [8, 128], strides = [1, 1]} : vector<8x512xf32> to vector<8x128xf32>
    %161 = arith.negf %160 : vector<8x128xf32>
    %162 = math.exp %161 : vector<8x128xf32>
    %cst_46 = arith.constant 1.000000e+00 : f32
    %163 = vector.broadcast %cst_46 : f32 to vector<8x128xf32>
    %164 = arith.addf %163, %162 : vector<8x128xf32>
    %165 = arith.divf %163, %164 : vector<8x128xf32>
    %166 = vector.extract_strided_slice %153 {offsets = [0, 256], sizes = [8, 128], strides = [1, 1]} : vector<8x512xf32> to vector<8x128xf32>
    %167 = math.tanh %166 : vector<8x128xf32>
    %168 = vector.extract_strided_slice %153 {offsets = [0, 384], sizes = [8, 128], strides = [1, 1]} : vector<8x512xf32> to vector<8x128xf32>
    %169 = arith.negf %168 : vector<8x128xf32>
    %170 = math.exp %169 : vector<8x128xf32>
    %cst_47 = arith.constant 1.000000e+00 : f32
    %171 = vector.broadcast %cst_47 : f32 to vector<8x128xf32>
    %172 = arith.addf %171, %170 : vector<8x128xf32>
    %173 = arith.divf %171, %172 : vector<8x128xf32>
    %174 = arith.mulf %165, %143 : vector<8x128xf32>
    %175 = arith.mulf %159, %167 : vector<8x128xf32>
    %176 = arith.addf %174, %175 : vector<8x128xf32>
    %177 = math.tanh %176 : vector<8x128xf32>
    %178 = arith.mulf %173, %177 : vector<8x128xf32>
    %179 = arith.addf %146, %178 : vector<8x128xf32>
    %c5_i32 = arith.constant 5 : i32
    %c8_i32_48 = arith.constant 8 : i32
    %180 = arith.muli %c5_i32, %c8_i32_48 : i32
    %181 = tpu.assume_multiple %180, 8 : i32
    %182 = arith.index_cast %181 : i32 to index
    %c0_49 = arith.constant 0 : index
    %183 = vector.load %arg11[%182, %c0_49] : memref<64x512xf32, #tpu.memory_space<vmem>>, vector<8x512xf32>
    %184 = arith.truncf %178 : vector<8x128xf32> to vector<8x128xbf16>
    %cst_50 = arith.constant dense<0.000000e+00> : vector<8x512xf32>
    %185 = tpu.matmul %184, %11, %cst_50 {dimension_numbers = #tpu.dot_dimension_numbers<[1], [0], [0], [1], [0, 0, 1, 1], [], []>} : vector<8x128xbf16>, vector<128x512xbf16>, vector<8x512xf32> -> vector<8x512xf32>
    %186 = arith.addf %183, %185 : vector<8x512xf32>
    %187 = vector.extract_strided_slice %186 {offsets = [0, 0], sizes = [8, 128], strides = [1, 1]} : vector<8x512xf32> to vector<8x128xf32>
    %188 = arith.negf %187 : vector<8x128xf32>
    %189 = math.exp %188 : vector<8x128xf32>
    %cst_51 = arith.constant 1.000000e+00 : f32
    %190 = vector.broadcast %cst_51 : f32 to vector<8x128xf32>
    %191 = arith.addf %190, %189 : vector<8x128xf32>
    %192 = arith.divf %190, %191 : vector<8x128xf32>
    %193 = vector.extract_strided_slice %186 {offsets = [0, 128], sizes = [8, 128], strides = [1, 1]} : vector<8x512xf32> to vector<8x128xf32>
    %194 = arith.negf %193 : vector<8x128xf32>
    %195 = math.exp %194 : vector<8x128xf32>
    %cst_52 = arith.constant 1.000000e+00 : f32
    %196 = vector.broadcast %cst_52 : f32 to vector<8x128xf32>
    %197 = arith.addf %196, %195 : vector<8x128xf32>
    %198 = arith.divf %196, %197 : vector<8x128xf32>
    %199 = vector.extract_strided_slice %186 {offsets = [0, 256], sizes = [8, 128], strides = [1, 1]} : vector<8x512xf32> to vector<8x128xf32>
    %200 = math.tanh %199 : vector<8x128xf32>
    %201 = vector.extract_strided_slice %186 {offsets = [0, 384], sizes = [8, 128], strides = [1, 1]} : vector<8x512xf32> to vector<8x128xf32>
    %202 = arith.negf %201 : vector<8x128xf32>
    %203 = math.exp %202 : vector<8x128xf32>
    %cst_53 = arith.constant 1.000000e+00 : f32
    %204 = vector.broadcast %cst_53 : f32 to vector<8x128xf32>
    %205 = arith.addf %204, %203 : vector<8x128xf32>
    %206 = arith.divf %204, %205 : vector<8x128xf32>
    %207 = arith.mulf %198, %176 : vector<8x128xf32>
    %208 = arith.mulf %192, %200 : vector<8x128xf32>
    %209 = arith.addf %207, %208 : vector<8x128xf32>
    %210 = math.tanh %209 : vector<8x128xf32>
    %211 = arith.mulf %206, %210 : vector<8x128xf32>
    %212 = arith.addf %179, %211 : vector<8x128xf32>
    %c6_i32 = arith.constant 6 : i32
    %c8_i32_54 = arith.constant 8 : i32
    %213 = arith.muli %c6_i32, %c8_i32_54 : i32
    %214 = tpu.assume_multiple %213, 8 : i32
    %215 = arith.index_cast %214 : i32 to index
    %c0_55 = arith.constant 0 : index
    %216 = vector.load %arg11[%215, %c0_55] : memref<64x512xf32, #tpu.memory_space<vmem>>, vector<8x512xf32>
    %217 = arith.truncf %211 : vector<8x128xf32> to vector<8x128xbf16>
    %cst_56 = arith.constant dense<0.000000e+00> : vector<8x512xf32>
    %218 = tpu.matmul %217, %11, %cst_56 {dimension_numbers = #tpu.dot_dimension_numbers<[1], [0], [0], [1], [0, 0, 1, 1], [], []>} : vector<8x128xbf16>, vector<128x512xbf16>, vector<8x512xf32> -> vector<8x512xf32>
    %219 = arith.addf %216, %218 : vector<8x512xf32>
    %220 = vector.extract_strided_slice %219 {offsets = [0, 0], sizes = [8, 128], strides = [1, 1]} : vector<8x512xf32> to vector<8x128xf32>
    %221 = arith.negf %220 : vector<8x128xf32>
    %222 = math.exp %221 : vector<8x128xf32>
    %cst_57 = arith.constant 1.000000e+00 : f32
    %223 = vector.broadcast %cst_57 : f32 to vector<8x128xf32>
    %224 = arith.addf %223, %222 : vector<8x128xf32>
    %225 = arith.divf %223, %224 : vector<8x128xf32>
    %226 = vector.extract_strided_slice %219 {offsets = [0, 128], sizes = [8, 128], strides = [1, 1]} : vector<8x512xf32> to vector<8x128xf32>
    %227 = arith.negf %226 : vector<8x128xf32>
    %228 = math.exp %227 : vector<8x128xf32>
    %cst_58 = arith.constant 1.000000e+00 : f32
    %229 = vector.broadcast %cst_58 : f32 to vector<8x128xf32>
    %230 = arith.addf %229, %228 : vector<8x128xf32>
    %231 = arith.divf %229, %230 : vector<8x128xf32>
    %232 = vector.extract_strided_slice %219 {offsets = [0, 256], sizes = [8, 128], strides = [1, 1]} : vector<8x512xf32> to vector<8x128xf32>
    %233 = math.tanh %232 : vector<8x128xf32>
    %234 = vector.extract_strided_slice %219 {offsets = [0, 384], sizes = [8, 128], strides = [1, 1]} : vector<8x512xf32> to vector<8x128xf32>
    %235 = arith.negf %234 : vector<8x128xf32>
    %236 = math.exp %235 : vector<8x128xf32>
    %cst_59 = arith.constant 1.000000e+00 : f32
    %237 = vector.broadcast %cst_59 : f32 to vector<8x128xf32>
    %238 = arith.addf %237, %236 : vector<8x128xf32>
    %239 = arith.divf %237, %238 : vector<8x128xf32>
    %240 = arith.mulf %231, %209 : vector<8x128xf32>
    %241 = arith.mulf %225, %233 : vector<8x128xf32>
    %242 = arith.addf %240, %241 : vector<8x128xf32>
    %243 = math.tanh %242 : vector<8x128xf32>
    %244 = arith.mulf %239, %243 : vector<8x128xf32>
    %245 = arith.addf %212, %244 : vector<8x128xf32>
    %c7_i32 = arith.constant 7 : i32
    %c8_i32_60 = arith.constant 8 : i32
    %246 = arith.muli %c7_i32, %c8_i32_60 : i32
    %247 = tpu.assume_multiple %246, 8 : i32
    %248 = arith.index_cast %247 : i32 to index
    %c0_61 = arith.constant 0 : index
    %249 = vector.load %arg11[%248, %c0_61] : memref<64x512xf32, #tpu.memory_space<vmem>>, vector<8x512xf32>
    %250 = arith.truncf %244 : vector<8x128xf32> to vector<8x128xbf16>
    %cst_62 = arith.constant dense<0.000000e+00> : vector<8x512xf32>
    %251 = tpu.matmul %250, %11, %cst_62 {dimension_numbers = #tpu.dot_dimension_numbers<[1], [0], [0], [1], [0, 0, 1, 1], [], []>} : vector<8x128xbf16>, vector<128x512xbf16>, vector<8x512xf32> -> vector<8x512xf32>
    %252 = arith.addf %249, %251 : vector<8x512xf32>
    %253 = vector.extract_strided_slice %252 {offsets = [0, 0], sizes = [8, 128], strides = [1, 1]} : vector<8x512xf32> to vector<8x128xf32>
    %254 = arith.negf %253 : vector<8x128xf32>
    %255 = math.exp %254 : vector<8x128xf32>
    %cst_63 = arith.constant 1.000000e+00 : f32
    %256 = vector.broadcast %cst_63 : f32 to vector<8x128xf32>
    %257 = arith.addf %256, %255 : vector<8x128xf32>
    %258 = arith.divf %256, %257 : vector<8x128xf32>
    %259 = vector.extract_strided_slice %252 {offsets = [0, 128], sizes = [8, 128], strides = [1, 1]} : vector<8x512xf32> to vector<8x128xf32>
    %260 = arith.negf %259 : vector<8x128xf32>
    %261 = math.exp %260 : vector<8x128xf32>
    %cst_64 = arith.constant 1.000000e+00 : f32
    %262 = vector.broadcast %cst_64 : f32 to vector<8x128xf32>
    %263 = arith.addf %262, %261 : vector<8x128xf32>
    %264 = arith.divf %262, %263 : vector<8x128xf32>
    %265 = vector.extract_strided_slice %252 {offsets = [0, 256], sizes = [8, 128], strides = [1, 1]} : vector<8x512xf32> to vector<8x128xf32>
    %266 = math.tanh %265 : vector<8x128xf32>
    %267 = vector.extract_strided_slice %252 {offsets = [0, 384], sizes = [8, 128], strides = [1, 1]} : vector<8x512xf32> to vector<8x128xf32>
    %268 = arith.negf %267 : vector<8x128xf32>
    %269 = math.exp %268 : vector<8x128xf32>
    %cst_65 = arith.constant 1.000000e+00 : f32
    %270 = vector.broadcast %cst_65 : f32 to vector<8x128xf32>
    %271 = arith.addf %270, %269 : vector<8x128xf32>
    %272 = arith.divf %270, %271 : vector<8x128xf32>
    %273 = arith.mulf %264, %242 : vector<8x128xf32>
    %274 = arith.mulf %258, %266 : vector<8x128xf32>
    %275 = arith.addf %273, %274 : vector<8x128xf32>
    %276 = math.tanh %275 : vector<8x128xf32>
    %277 = arith.mulf %272, %276 : vector<8x128xf32>
    %278 = arith.addf %245, %277 : vector<8x128xf32>
    %c8_i32_66 = arith.constant 8 : i32
    %c0_67 = arith.constant 0 : index
    %c0_68 = arith.constant 0 : index
    %279 = vector.load %arg12[%c0_67, %c0_68] : memref<8x128xf32, #tpu.memory_space<vmem>>, vector<8x128xf32>
    tpu.vector_store %arg12[%c0_67, %c0_68], %277 {strides = array<i32>} : memref<8x128xf32, #tpu.memory_space<vmem>>, vector<8x128xf32>,
    %c0_69 = arith.constant 0 : index
    %c0_70 = arith.constant 0 : index
    %280 = vector.load %arg13[%c0_69, %c0_70] : memref<8x128xf32, #tpu.memory_space<vmem>>, vector<8x128xf32>
    tpu.vector_store %arg13[%c0_69, %c0_70], %275 {strides = array<i32>} : memref<8x128xf32, #tpu.memory_space<vmem>>, vector<8x128xf32>,
    %c0_71 = arith.constant 0 : index
    %c0_72 = arith.constant 0 : index
    %281 = vector.load %arg14[%c0_71, %c0_72] : memref<8x128xf32, #tpu.memory_space<vmem>>, vector<8x128xf32>
    tpu.vector_store %arg14[%c0_71, %c0_72], %278 {strides = array<i32>} : memref<8x128xf32, #tpu.memory_space<vmem>>, vector<8x128xf32>,
    %c0_i32_73 = arith.constant 0 : i32
    %282 = arith.cmpi eq, %arg1, %c0_i32_73 : i32
    %283 = arith.extui %282 : i1 to i32
    %c0_i32_74 = arith.constant 0 : i32
    %284 = arith.cmpi ne, %283, %c0_i32_74 : i32
    scf.if %284 {
      %cst_75 = arith.constant 1.250000e-01 : f32
      %285 = vector.broadcast %cst_75 : f32 to vector<8x128xf32>
      %286 = arith.mulf %278, %285 : vector<8x128xf32>
      %c0_76 = arith.constant 0 : index
      %c0_77 = arith.constant 0 : index
      %287 = vector.load %arg6[%c0_76, %c0_77] : memref<128x1xf32, #tpu.memory_space<vmem>>, vector<128x1xf32>
      %cst_78 = arith.constant dense<0.000000e+00> : vector<8x1xf32>
      %288 = tpu.matmul %286, %287, %cst_78 {dimension_numbers = #tpu.dot_dimension_numbers<[1], [0], [0], [1], [0, 0, 1, 1], [], []>} : vector<8x128xf32>, vector<128x1xf32>, vector<8x1xf32> -> vector<8x1xf32>
      %c0_79 = arith.constant 0 : index
      %c0_80 = arith.constant 0 : index
      %289 = vector.load %arg7[%c0_79, %c0_80] : memref<1x1xf32, #tpu.memory_space<vmem>>, vector<1x1xf32>
      %290 = vector.broadcast %289 : vector<1x1xf32> to vector<8x1xf32>
      %291 = arith.addf %288, %290 : vector<8x1xf32>
      %c0_81 = arith.constant 0 : index
      %c0_82 = arith.constant 0 : index
      %292 = vector.load %arg8[%c0_81, %c0_82] : memref<8x1xf32, #tpu.memory_space<vmem>>, vector<8x1xf32>
      tpu.vector_store %arg8[%c0_81, %c0_82], %291 {strides = array<i32>} : memref<8x1xf32, #tpu.memory_space<vmem>>, vector<8x1xf32>,
      %c0_83 = arith.constant 0 : index
      %c0_84 = arith.constant 0 : index
      %293 = vector.load %arg9[%c0_83, %c0_84] : memref<8x128xf32, #tpu.memory_space<vmem>>, vector<8x128xf32>
      tpu.vector_store %arg9[%c0_83, %c0_84], %277 {strides = array<i32>} : memref<8x128xf32, #tpu.memory_space<vmem>>, vector<8x128xf32>,
      %c0_85 = arith.constant 0 : index
      %c0_86 = arith.constant 0 : index
      %294 = vector.load %arg10[%c0_85, %c0_86] : memref<8x128xf32, #tpu.memory_space<vmem>>, vector<8x128xf32>
      tpu.vector_store %arg10[%c0_85, %c0_86], %275 {strides = array<i32>} : memref<8x128xf32, #tpu.memory_space<vmem>>, vector<8x128xf32>,
    } else {
    }
    return
  }
  func.func @transform_0(%arg0: i32, %arg1: i32) -> (i32, i32, i32, i32) {
    %c0_i32 = arith.constant 0 : i32
    %c0_i32_0 = arith.constant 0 : i32
    %c0_i32_1 = arith.constant 0 : i32
    return %arg0, %arg1, %c0_i32, %c0_i32_0 : i32, i32, i32, i32
  }
  func.func @transform_1(%arg0: i32, %arg1: i32) -> (i32, i32) {
    %c0_i32 = arith.constant 0 : i32
    %c0_i32_0 = arith.constant 0 : i32
    %c0_i32_1 = arith.constant 0 : i32
    return %c0_i32, %c0_i32_0 : i32, i32
  }
  func.func @transform_2(%arg0: i32, %arg1: i32) -> (i32, i32) {
    %c0_i32 = arith.constant 0 : i32
    %c0_i32_0 = arith.constant 0 : i32
    %c0_i32_1 = arith.constant 0 : i32
    return %c0_i32, %c0_i32_0 : i32, i32
  }
  func.func @transform_3(%arg0: i32, %arg1: i32) -> (i32, i32) {
    %c0_i32 = arith.constant 0 : i32
    %c0_i32_0 = arith.constant 0 : i32
    %c0_i32_1 = arith.constant 0 : i32
    return %c0_i32, %c0_i32_0 : i32, i32
  }
  func.func @transform_4(%arg0: i32, %arg1: i32) -> (i32, i32) {
    %c0_i32 = arith.constant 0 : i32
    %c0_i32_0 = arith.constant 0 : i32
    %c0_i32_1 = arith.constant 0 : i32
    return %c0_i32, %c0_i32_0 : i32, i32
  }
  func.func @transform_5(%arg0: i32, %arg1: i32) -> (i32, i32) {
    %c0_i32 = arith.constant 0 : i32
    %c0_i32_0 = arith.constant 0 : i32
    %c0_i32_1 = arith.constant 0 : i32
    return %c0_i32, %c0_i32_0 : i32, i32
  }
  func.func @transform_6(%arg0: i32, %arg1: i32) -> (i32, i32) {
    %c0_i32 = arith.constant 0 : i32
    %c0_i32_0 = arith.constant 0 : i32
    return %arg0, %c0_i32 : i32, i32
  }
  func.func @transform_7(%arg0: i32, %arg1: i32) -> (i32, i32) {
    %c0_i32 = arith.constant 0 : i32
    %c0_i32_0 = arith.constant 0 : i32
    return %arg0, %c0_i32 : i32, i32
  }
  func.func @transform_8(%arg0: i32, %arg1: i32) -> (i32, i32) {
    %c0_i32 = arith.constant 0 : i32
    %c0_i32_0 = arith.constant 0 : i32
    return %arg0, %c0_i32 : i32, i32
  }
}

</mosaic_0001>

<bundles_post_ra>
// kernel: lstm_discriminator_forward.1
= control target key start
LH: loop header
LB: loop body
LE: loop exit
PB: predicated region body
PF: predicated region fallthrough
CT: control target
= control target key end

     0   :  { %s2978_s0 = inlined_call_operand.hbm [shape: bf16[1,1,64,16], index: 0, kind: input, shape index: {}]   ;;  %s2979_s1 = inlined_call_operand.hbm [shape: bf16[16,512], index: 1, kind: input, shape index: {}]   ;;  %s2980_s2 = inlined_call_operand.hbm [shape: bf16[128,512], index: 2, kind: input, shape index: {}]   ;;  %s2981_s3 = inlined_call_operand.hbm [shape: f32[1,512], index: 3, kind: input, shape index: {}]   ;;  %s2982_s4 = inlined_call_operand.hbm [shape: f32[128,1], index: 4, kind: input, shape index: {}]   ;;  %s2983_s5 = inlined_call_operand.<no memory space> [shape: f32[1,1], index: 5, kind: input, shape index: {}]   ;;  %s2984_s6 = inlined_call_operand.hbm [shape: f32[8,1], index: 6, kind: output, shape index: {0}]   ;;  %s2985_s7 = inlined_call_operand.hbm [shape: f32[8,128], index: 7, kind: output, shape index: {1}]   ;;  %s2986_s8 = inlined_call_operand.hbm [shape: f32[8,128], index: 8, kind: output, shape index: {2}]  }
   0x1   :  { %v14_v0 = vstv %s2983_s5 }
   0x2   :  { %15 = vst [vmem:[#allocation6] sm:$0x1] %v14_v0 }
   0x3   :  { %16 = vsyncpa [#allocation8], 0 }
   0x4   :  { %17 = vsyncpa [#allocation11], 0 }
   0x5   :  { %18 = vsyncpa [#allocation14], 0 }
   0x6   :  { %19 = vsyncpa [#allocation9], 0 }
   0x7   :  { %20 = vsyncpa [#allocation18], 0  ;;  %s2242_s29 = smov [#allocation10]   ;;  %s2056_s11 = scalar_lea.hbm %s2979_s1, 512 }
   0x8   :  { %s38_s30 = sshll.u32 %s2242_s29, 4  ;;  %p2057_p0 = scmp.ne.s32.totalorder %s2979_s1, %s2056_s11  ;;  %s39_s30 = int_to_ptr.vmem [resolvable:$true] %s38_s30 }
   0x9   :  { %p2060_p1 = scmp.lt.u32.totalorder %s2056_s11, %s2979_s1 }
   0xb   :  { %p2062_p2 = pnand %p2060_p1, %p2057_p0 }
   0xd   :  { %2065 = shalt.err (!%p2062_p2)
}
   0xe   :  { %s2066_s5 = scalar_lea.vmem %s39_s30, 512  ;;  %p2071_p4 = scmp.lt.s32.totalorder %s39_s30, %s39_s30 }
   0xf   :  { %p2067_p3 = scmp.ne.s32.totalorder %s39_s30, %s2066_s5  ;;  %p2072_p5 = scmp.lt.s32.totalorder %s2066_s5, %s2066_s5 }
  0x11   :  { %p2073_p6 = por %p2072_p5, %p2071_p4 }
  0x13   :  { %p2074_p7 = pnand %p2073_p6, %p2067_p3 }
  0x15   :  { %2077 = shalt.err (!%p2074_p7)
}
  0x16   :  { %s2243_s16 = smov 256   ;;  %s2244_s17 = smov 16  }
  0x17   :  { %44 = dma.hbm_to_vmem [thread:$0]  %s2979_s1, 512, %s39_s30, [#allocation11], %s2243_s16, %s2243_s16, %s2244_s17  }
  0x18   :  { %s2245_s20 = smov [#allocation13]   ;;  %s2246_s22 = smov [#allocation7]  }
  0x19   :  { %s63_s21 = sshll.u32 %s2245_s20, 4  ;;  %s26_s23 = sshll.u32 %s2246_s22, 4  ;;  %s64_s21 = int_to_ptr.vmem [resolvable:$true] %s63_s21  ;;  %s27_s23 = int_to_ptr.vmem [resolvable:$true] %s26_s23 }
  0x1a   :  { %s2078_s26 = scalar_lea.hbm %s2981_s3, 64 }
  0x1b   :  { %p2079_p8 = scmp.ne.s32.totalorder %s2981_s3, %s2078_s26  ;;  %p2082_p9 = scmp.lt.u32.totalorder %s2078_s26, %s2981_s3 }
  0x1d   :  { %p2084_p10 = pnand %p2082_p9, %p2079_p8 }
  0x1f   :  { %2087 = shalt.err (!%p2084_p10)
}
  0x20   :  { %s2088_s1 = scalar_lea.vmem %s64_s21, 64  ;;  %p2093_p12 = scmp.lt.s32.totalorder %s64_s21, %s64_s21 }
  0x21   :  { %p2089_p11 = scmp.ne.s32.totalorder %s64_s21, %s2088_s1  ;;  %p2094_p13 = scmp.lt.s32.totalorder %s2088_s1, %s2088_s1 }
  0x23   :  { %p2095_p0 = por %p2094_p13, %p2093_p12 }
  0x25   :  { %p2096_p1 = pnand %p2095_p0, %p2089_p11 }
  0x27   :  { %2099 = shalt.err (!%p2096_p1)
}
  0x28   :  { %66 = dma.hbm_to_vmem [thread:$0]  %s2981_s3, 64, %s64_s21, [#allocation14]  }
  0x29   :  { %s2100_s13 = scalar_lea.hbm %s2978_s0, 512 }
  0x2a   :  { %p2101_p2 = scmp.ne.s32.totalorder %s2978_s0, %s2100_s13  ;;  %p2104_p3 = scmp.lt.u32.totalorder %s2100_s13, %s2978_s0 }
  0x2c   :  { %p2106_p4 = pnand %p2104_p3, %p2101_p2 }
  0x2e   :  { %2109 = shalt.err (!%p2106_p4)
}
  0x2f   :  { %s2110_s19 = scalar_lea.vmem %s27_s23, 512  ;;  %p2115_p6 = scmp.lt.s32.totalorder %s27_s23, %s27_s23 }
  0x30   :  { %p2111_p5 = scmp.ne.s32.totalorder %s27_s23, %s2110_s19  ;;  %p2116_p7 = scmp.lt.s32.totalorder %s2110_s19, %s2110_s19 }
  0x32   :  { %p2117_p8 = por %p2116_p7, %p2115_p6 }
  0x34   :  { %p2118_p9 = pnand %p2117_p8, %p2111_p5 }
  0x36   :  { %2121 = shalt.err (!%p2118_p9)
}
  0x37   :  { %s2247_s3 = smov 64   ;;  %s2248_s20 = smov 4  }
  0x38   :  { %32 = dma.hbm_to_vmem [thread:$0]  %s2978_s0, 512, %s27_s23, [#allocation8], %s2247_s3, %s2247_s3, %s2248_s20  }
  0x39   :  { %s2249_s24 = smov [#allocation12]   ;;  %s2250_s26 = smov [#allocation15]  }
  0x3a   :  { %s50_s25 = sshll.u32 %s2249_s24, 4  ;;  %s72_s27 = sshll.u32 %s2250_s26, 4  ;;  %s51_s25 = int_to_ptr.vmem [resolvable:$true] %s50_s25  ;;  %s73_s27 = int_to_ptr.vmem [resolvable:$true] %s72_s27 }
  0x3b   :  { %s2122_s9 = scalar_lea.hbm %s2980_s2, 4096 }
  0x3c   :  { %p2123_p10 = scmp.ne.s32.totalorder %s2980_s2, %s2122_s9  ;;  %p2126_p11 = scmp.lt.u32.totalorder %s2122_s9, %s2980_s2 }
  0x3e   :  { %p2128_p12 = pnand %p2126_p11, %p2123_p10 }
  0x40   :  { %2131 = shalt.err (!%p2128_p12)
}
  0x41   :  { %s2132_s0 = scalar_lea.vmem %s51_s25, 4096  ;;  %p2137_p0 = scmp.lt.s32.totalorder %s51_s25, %s51_s25 }
  0x42   :  { %p2133_p13 = scmp.ne.s32.totalorder %s51_s25, %s2132_s0  ;;  %p2138_p1 = scmp.lt.s32.totalorder %s2132_s0, %s2132_s0 }
  0x44   :  { %p2139_p2 = por %p2138_p1, %p2137_p0 }
  0x46   :  { %p2140_p3 = pnand %p2139_p2, %p2133_p13 }
  0x48   :  { %2143 = shalt.err (!%p2140_p3)
}
  0x49   :  { %56 = dma.hbm_to_vmem [thread:$0]  %s2980_s2, 4096, %s51_s25, [#allocation11], %s2243_s16, %s2243_s16, %s2244_s17  }
  0x4a   :  { %s2144_s15 = scalar_lea.hbm %s2982_s4, 2048 }
  0x4b   :  { %p2145_p4 = scmp.ne.s32.totalorder %s2982_s4, %s2144_s15  ;;  %p2148_p5 = scmp.lt.u32.totalorder %s2144_s15, %s2982_s4 }
  0x4d   :  { %p2150_p6 = pnand %p2148_p5, %p2145_p4 }
  0x4f   :  { %2153 = shalt.err (!%p2150_p6)
}
  0x50   :  { %s2154_s20 = scalar_lea.vmem %s73_s27, 2048  ;;  %p2159_p8 = scmp.lt.s32.totalorder %s73_s27, %s73_s27 }
  0x51   :  { %p2155_p7 = scmp.ne.s32.totalorder %s73_s27, %s2154_s20  ;;  %p2160_p9 = scmp.lt.s32.totalorder %s2154_s20, %s2154_s20 }
  0x53   :  { %p2161_p10 = por %p2160_p9, %p2159_p8 }
  0x55   :  { %p2162_p11 = pnand %p2161_p10, %p2155_p7 }
  0x57   :  { %2165 = shalt.err (!%p2162_p11)
}
  0x58   :  { %s2251_s2 = smov 128   ;;  %s2252_s16 = smov 8  }
  0x59   :  { %78 = dma.hbm_to_vmem [thread:$0]  %s2982_s4, 2048, %s73_s27, [#allocation14], %s2251_s2, %s2251_s2, %s2252_s16  }
  0x5a   :  { %2232 = dma.done.wait [#allocation8], 512  }
  0x5b   :  { %2233 = vsyncadd [#allocation8], 4294966784 }
  0x5c   :  { %2234 = dma.done.wait [#allocation11], 4608  }
  0x5d   :  { %2235 = vsyncadd [#allocation11], 4294962688 }
  0x5e   :  { %2236 = dma.done.wait [#allocation14], 2112  }
  0x5f   :  { %2237 = vsyncadd [#allocation14], 4294965184  ;;  %v2989_v1 = vmov 0   ;;  %v1838_v2 = vld [vmem:[#allocation10 + $0x4] ss:$16 sps:$4 sm:$0xff]   ;;  %vm178_vm0 = vcmask 130048   ;;  %v118_v43 = vlaneseq }
  0x60   :  { %223 = vmatprep.mubr.bf16.mxu0 %v2989_v1  ;;  %296 = vmatprep.mubr.bf16.mxu1 %v2989_v1  ;;  %v1840_v3 = vld [vmem:[#allocation10 + $0xc] ss:$16 sps:$4 sm:$0xff]   ;;  %v1842_v4 = vld [vmem:[#allocation10] ss:$16 sps:$4 sm:$0xff]   ;;  %v1843_v5 = vld [vmem:[#allocation10 + $0x8] ss:$16 sps:$4 sm:$0xff]  }
  0x61   :  { %191 = vmatprep.subr.bf16.mxu0 %v1838_v2  ;;  %264 = vmatprep.subr.bf16.mxu1 %v1840_v3  ;;  %v1844_v6 = vld [vmem:[#allocation7] sm:$0xff]   ;;  %v2378_v8 = vld [vmem:[#allocation12 + $0xc] ss:$16 sps:$4 sm:$0xff]   ;;  %v2383_v10 = vld [vmem:[#allocation12 + $0x8] ss:$16 sps:$4 sm:$0xff]   ;;  %v2987_v42 = vmov 0.0|0.0  }
  0x62   :  { %192 = vmatpush1.bf16.msra.mxu0 %v1842_v4  ;;  %265 = vmatpush1.bf16.msra.mxu1 %v1843_v5  ;;  %v2376_v7 = vld [vmem:[#allocation12 + $0x4] ss:$16 sps:$4 sm:$0xff]   ;;  %v2380_v9 = vld [vmem:[#allocation12] ss:$16 sps:$4 sm:$0xff]   ;;  %v2391_v12 = vld [vmem:[#allocation12 + $0x2c] ss:$16 sps:$4 sm:$0xff]  }
  0x63   :  { %572 = vmatprep.subr.bf16.mxu0 %v2376_v7  ;;  %v2387_v11 = vld [vmem:[#allocation12 + $0x24] ss:$16 sps:$4 sm:$0xff]   ;;  %613 = vmatprep.subr.bf16.mxu1 %v2378_v8  ;;  %v2393_v13 = vld [vmem:[#allocation12 + $0x20] ss:$16 sps:$4 sm:$0xff]   ;;  %v2395_v14 = vld [vmem:[#allocation12 + $0x28] ss:$16 sps:$4 sm:$0xff]  }
  0x64   :  { %v1857_v15 = vld [vmem:[#allocation7 + $0x8] sm:$0xff]   ;;  %v2401_v16 = vld [vmem:[#allocation12 + $0x44] ss:$16 sps:$4 sm:$0xff]   ;;  %v2407_v18 = vld [vmem:[#allocation12 + $0x40] ss:$16 sps:$4 sm:$0xff]   ;;  %v119_v44 = vshrl.u32 %v118_v43, 7 }
  0x65   :  { %1679 = vmatmul.mubr.msk.bf16.vlgmr.msra.gmra.mrb[0].mxu0 %vm178_vm0, %v1844_v6  ;;  %1683 = vmatmul.mubr.msk.bf16.vlgmr.msra.gmra.mrb[0].mxu1 %vm178_vm0, %v1844_v6  ;;  %v2404_v17 = vld [vmem:[#allocation12 + $0x4c] ss:$16 sps:$4 sm:$0xff]   ;;  %v2409_v19 = vld [vmem:[#allocation12 + $0x48] ss:$16 sps:$4 sm:$0xff]   ;;  %v2413_v20 = vld [vmem:[#allocation12 + $0x64] ss:$16 sps:$4 sm:$0xff]  }
  0x66   :  { %573 = vmatpush1.bf16.msra.mxu0 %v2380_v9  ;;  %614 = vmatpush1.bf16.msra.mxu1 %v2383_v10  ;;  %v2416_v21 = vld [vmem:[#allocation12 + $0x6c] ss:$16 sps:$4 sm:$0xff]   ;;  %v2420_v22 = vld [vmem:[#allocation12 + $0x60] ss:$16 sps:$4 sm:$0xff]   ;;  %v2423_v23 = vld [vmem:[#allocation12 + $0x68] ss:$16 sps:$4 sm:$0xff]  }
  0x67   :  { %574 = vmatprep.subr.bf16.mxu0 %v2387_v11  ;;  %615 = vmatprep.subr.bf16.mxu1 %v2391_v12  ;;  %v2428_v24 = vld [vmem:[#allocation12 + $0x84] ss:$16 sps:$4 sm:$0xff]   ;;  %v2432_v25 = vld [vmem:[#allocation12 + $0x8c] ss:$16 sps:$4 sm:$0xff]   ;;  %v2435_v27 = vld [vmem:[#allocation12 + $0x80] ss:$16 sps:$4 sm:$0xff]  }
  0x68   :  { %233 = vmatprep.mubr.bf16.mxu0 %v2989_v1  ;;  %306 = vmatprep.mubr.bf16.mxu1 %v2989_v1  ;;  %v1870_v26 = vld [vmem:[#allocation7 + $0x10] sm:$0xff]   ;;  %v2439_v28 = vld [vmem:[#allocation12 + $0x88] ss:$16 sps:$4 sm:$0xff]   ;;  %v2444_v30 = vld [vmem:[#allocation12 + $0xac] ss:$16 sps:$4 sm:$0xff]   ;;  %v128_v45 = vsub.s32 2, %v119_v44 }
  0x69   :  { %v2441_v29 = vld [vmem:[#allocation12 + $0xa4] ss:$16 sps:$4 sm:$0xff]   ;;  %v2449_v31 = vld [vmem:[#allocation12 + $0xa0] ss:$16 sps:$4 sm:$0xff]   ;;  %v2451_v32 = vld [vmem:[#allocation12 + $0xa8] ss:$16 sps:$4 sm:$0xff]  }
  0x6a   :  { %575 = vmatpush1.bf16.msra.mxu0 %v2393_v13  ;;  %616 = vmatpush1.bf16.msra.mxu1 %v2395_v14  ;;  %v2456_v33 = vld [vmem:[#allocation12 + $0xc4] ss:$16 sps:$4 sm:$0xff]   ;;  %v2460_v34 = vld [vmem:[#allocation12 + $0xcc] ss:$16 sps:$4 sm:$0xff]   ;;  %v2463_v36 = vld [vmem:[#allocation12 + $0xc0] ss:$16 sps:$4 sm:$0xff]  }
  0x6b   :  { %576 = vmatprep.subr.bf16.mxu0 %v2401_v16  ;;  %617 = vmatprep.subr.bf16.mxu1 %v2404_v17  ;;  %v1883_v35 = vld [vmem:[#allocation7 + $0x18] sm:$0xff]   ;;  %v2469_v38 = vld [vmem:[#allocation12 + $0xe4] ss:$16 sps:$4 sm:$0xff]   ;;  %v2477_v40 = vld [vmem:[#allocation12 + $0xe0] ss:$16 sps:$4 sm:$0xff]   ;;  %v132_v46 = vsub.s32 3, %v119_v44 }
  0x6c   :  { %v2467_v37 = vld [vmem:[#allocation12 + $0xc8] ss:$16 sps:$4 sm:$0xff]   ;;  %v2472_v39 = vld [vmem:[#allocation12 + $0xec] ss:$16 sps:$4 sm:$0xff]   ;;  %v120_v47 = vsub.s32 0, %v119_v44  ;;  %v124_v49 = vsub.s32 1, %v119_v44 }
  0x6d   :  { %1680 = vmatmul.mubr.msk.bf16.gmra.mrb[4].mxu0 %vm178_vm0, %v1857_v15  ;;  %1684 = vmatmul.mubr.msk.bf16.gmra.mrb[4].mxu1 %vm178_vm0, %v1857_v15  ;;  %v2482_v41 = vld [vmem:[#allocation12 + $0xe8] ss:$16 sps:$4 sm:$0xff]   ;;  %v116_v48 = vld [vmem:[#allocation13] sm:$0xf]  ;;  %vm2255_vm1 = vmmov 0   ;;  %s2257_s4 = smov [#allocation17]  }
  0x6e   :  { %577 = vmatpush1.bf16.msra.mxu0 %v2407_v18  ;;  %243 = vmatprep.mubr.bf16.mxu0 %v2989_v1  ;;  %v2526_v50 = vrot.slane %v116_v48, %v128_v45  ;;  %v2532_v53 = vrot.slane %v116_v48, %v132_v46  ;;  %v121_v54 = vrot.slane %v116_v48, %v120_v47  ;;  %s1636_s22 = sshll.u32 %s2257_s4, 4  ;;  %s1637_s22 = int_to_ptr.vmem [resolvable:$true] %s1636_s22 }
  0x6f   :  { %618 = vmatpush1.bf16.msra.mxu1 %v2409_v19  ;;  %578 = vmatprep.subr.bf16.mxu0 %v2413_v20  ;;  %v125_v57 = vrot.slane %v116_v48, %v124_v49  ;;  %s2166_s24 = scalar_lea.vmem %s1637_s22, 128  ;;  %p2171_p13 = scmp.lt.s32.totalorder %s1637_s22, %s1637_s22 }
  0x70   :  { %619 = vmatprep.subr.bf16.mxu1 %v2416_v21  ;;  %316 = vmatprep.mubr.bf16.mxu1 %v2989_v1  ;;  %p2167_p12 = scmp.ne.s32.totalorder %s1637_s22, %s2166_s24  ;;  %p2172_p0 = scmp.lt.s32.totalorder %s2166_s24, %s2166_s24 }
  0x72   :  { %579 = vmatpush1.bf16.msra.mxu0 %v2420_v22  ;;  %p2173_p1 = por %p2172_p0, %p2171_p13 }
  0x73   :  { %620 = vmatpush1.bf16.msra.mxu1 %v2423_v23  ;;  %580 = vmatprep.subr.bf16.mxu0 %v2428_v24 }
  0x74   :  { %621 = vmatprep.subr.bf16.mxu1 %v2432_v25  ;;  %p2174_p2 = pnand %p2173_p1, %p2167_p12 }
  0x75   :  { %1681 = vmatmul.mubr.msk.bf16.gmra.mrb[8].mxu0 %vm178_vm0, %v1870_v26  ;;  %1685 = vmatmul.mubr.msk.bf16.gmra.mrb[8].mxu1 %vm178_vm0, %v1870_v26 }
  0x76   :  { %581 = vmatpush1.bf16.msra.mxu0 %v2435_v27  ;;  %253 = vmatprep.mubr.bf16.mxu0 %v2989_v1 }
  0x77   :  { %622 = vmatpush1.bf16.msra.mxu1 %v2439_v28  ;;  %582 = vmatprep.subr.bf16.mxu0 %v2441_v29 }
  0x78   :  { %623 = vmatprep.subr.bf16.mxu1 %v2444_v30  ;;  %326 = vmatprep.mubr.bf16.mxu1 %v2989_v1 }
  0x7a   :  { %583 = vmatpush1.bf16.msra.mxu0 %v2449_v31 }
  0x7b   :  { %624 = vmatpush1.bf16.msra.mxu1 %v2451_v32  ;;  %584 = vmatprep.subr.bf16.mxu0 %v2456_v33 }
  0x7c   :  { %625 = vmatprep.subr.bf16.mxu1 %v2460_v34 }
  0x7d   :  { %1682 = vmatmul.mubr.msk.bf16.gmra.mrb[12].mxu0 %vm178_vm0, %v1883_v35  ;;  %1686 = vmatmul.mubr.msk.bf16.gmra.mrb[12].mxu1 %vm178_vm0, %v1883_v35 }
  0x7e   :  { %585 = vmatpush1.bf16.msra.mxu0 %v2463_v36  ;;  %604 = vmatprep.mubr.bf16.mxu0 %v2989_v1 }
  0x7f   :  { %626 = vmatpush1.bf16.msra.mxu1 %v2467_v37  ;;  %586 = vmatprep.subr.bf16.mxu0 %v2469_v38 }
  0x80   :  { %627 = vmatprep.subr.bf16.mxu1 %v2472_v39  ;;  %645 = vmatprep.mubr.bf16.mxu1 %v2989_v1 }
  0x82   :  { %587 = vmatpush1.bf16.msra.mxu0 %v2477_v40 }
  0x83   :  { %628 = vmatpush1.bf16.msra.mxu1 %v2482_v41  ;;  %691 = vmatprep.subr.bf16.mxu0 %v2376_v7 }
  0x84   :  { %732 = vmatprep.subr.bf16.mxu1 %v2378_v8 }
  0x85   :  { %605 = vmatmul.mubr.bf16.vlgmr.msra.gmra.mrb[16].mxu0 %v2987_v42 }
  0x86   :  { %646 = vmatmul.mubr.bf16.vlgmr.msra.gmra.mrb[16].mxu1 %v2987_v42  ;;  %692 = vmatpush1.bf16.msra.mxu0 %v2380_v9 }
  0x87   :  { %733 = vmatpush1.bf16.msra.mxu1 %v2383_v10  ;;  %693 = vmatprep.subr.bf16.mxu0 %v2387_v11 }
  0x88   :  { %734 = vmatprep.subr.bf16.mxu1 %v2391_v12  ;;  %723 = vmatprep.mubr.bf16.mxu0 %v2989_v1 }
  0x89   :  { %764 = vmatprep.mubr.bf16.mxu1 %v2989_v1 }
  0x8a   :  { %694 = vmatpush1.bf16.msra.mxu0 %v2393_v13 }
  0x8b   :  { %735 = vmatpush1.bf16.msra.mxu1 %v2395_v14  ;;  %695 = vmatprep.subr.bf16.mxu0 %v2401_v16 }
  0x8c   :  { %736 = vmatprep.subr.bf16.mxu1 %v2404_v17 }
  0x8e   :  { %696 = vmatpush1.bf16.msra.mxu0 %v2407_v18 }
  0x8f   :  { %737 = vmatpush1.bf16.msra.mxu1 %v2409_v19  ;;  %697 = vmatprep.subr.bf16.mxu0 %v2413_v20 }
  0x90   :  { %738 = vmatprep.subr.bf16.mxu1 %v2416_v21 }
  0x92   :  { %698 = vmatpush1.bf16.msra.mxu0 %v2420_v22 }
  0x93   :  { %739 = vmatpush1.bf16.msra.mxu1 %v2423_v23  ;;  %699 = vmatprep.subr.bf16.mxu0 %v2428_v24 }
  0x94   :  { %740 = vmatprep.subr.bf16.mxu1 %v2432_v25 }
  0x96   :  { %700 = vmatpush1.bf16.msra.mxu0 %v2435_v27 }
  0x97   :  { %741 = vmatpush1.bf16.msra.mxu1 %v2439_v28  ;;  %701 = vmatprep.subr.bf16.mxu0 %v2441_v29 }
  0x98   :  { %742 = vmatprep.subr.bf16.mxu1 %v2444_v30 }
  0x9a   :  { %702 = vmatpush1.bf16.msra.mxu0 %v2449_v31 }
  0x9b   :  { %743 = vmatpush1.bf16.msra.mxu1 %v2451_v32  ;;  %703 = vmatprep.subr.bf16.mxu0 %v2456_v33 }
  0x9c   :  { %744 = vmatprep.subr.bf16.mxu1 %v2460_v34 }
  0x9e   :  { %704 = vmatpush1.bf16.msra.mxu0 %v2463_v36 }
  0x9f   :  { %745 = vmatpush1.bf16.msra.mxu1 %v2467_v37  ;;  %705 = vmatprep.subr.bf16.mxu0 %v2469_v38 }
  0xa0   :  { %746 = vmatprep.subr.bf16.mxu1 %v2472_v39 }
  0xa2   :  { %706 = vmatpush1.bf16.msra.mxu0 %v2477_v40 }
  0xa3   :  { %747 = vmatpush1.bf16.msra.mxu1 %v2482_v41  ;;  %810 = vmatprep.subr.bf16.mxu0 %v2376_v7 }
  0xa4   :  { %851 = vmatprep.subr.bf16.mxu1 %v2378_v8 }
 0x138   :  { %v2528_v51 = vpop.f32.mrb[0].mxu0  ;;  %v2530_v52 = vpop.f32.mrb[0].mxu1 }
 0x139   :  { %v227_v55 = vpop.f32.mrb[1].mxu0  ;;  %v300_v56 = vpop.f32.mrb[1].mxu1 }
 0x13a   :  { %v229_v58 = vpop.f32.mrb[2].mxu0  ;;  %v302_v59 = vpop.f32.mrb[2].mxu1 }
 0x13b   :  { %v2534_v60 = vadd.f32 %v229_v58, %v121_v54  ;;  %v231_v61 = vpop.f32.mrb[3].mxu0  ;;  %v2537_v62 = vadd.f32 %v302_v59, %v2526_v50  ;;  %v304_v63 = vpop.f32.mrb[3].mxu1 }
 0x13c   :  { %v2539_v0 = vadd.f32 %v231_v61, %v125_v57  ;;  %v2542_v2 = vadd.f32 %v304_v63, %v2532_v53 }
 0x140   :  { %v235_v3 = vpop.f32.mrb[4].mxu0  ;;  %v308_v4 = vpop.f32.mrb[4].mxu1 }
 0x141   :  { %v2544_v5 = vadd.f32 %v235_v3, %v121_v54  ;;  %v237_v6 = vpop.f32.mrb[5].mxu0  ;;  %v2547_v15 = vadd.f32 %v308_v4, %v2526_v50  ;;  %v310_v26 = vpop.f32.mrb[5].mxu1 }
 0x142   :  { %v2549_v35 = vadd.f32 %v237_v6, %v125_v57  ;;  %v239_v43 = vpop.f32.mrb[6].mxu0  ;;  %v2552_v44 = vadd.f32 %v310_v26, %v2532_v53  ;;  %v312_v45 = vpop.f32.mrb[6].mxu1 }
 0x143   :  { %v2554_v46 = vadd.f32 %v239_v43, %v121_v54  ;;  %v241_v47 = vpop.f32.mrb[7].mxu0  ;;  %v2557_v48 = vadd.f32 %v312_v45, %v2526_v50  ;;  %v314_v49 = vpop.f32.mrb[7].mxu1 }
 0x144   :  { %2991 = vst [vmem:[#allocation25_spill] sm:$0xff] %v2552_v44  ;;  %v2559_v58 = vadd.f32 %v241_v47, %v125_v57  ;;  %v2562_v59 = vadd.f32 %v314_v49, %v2532_v53 }
 0x145   :  { %2992 = vst [vmem:[#allocation26_spill] sm:$0xff] %v2554_v46  ;;  %2993 = vst [vmem:[#allocation27_spill] sm:$0xff] %v2557_v48 }
 0x146   :  { %2994 = vst [vmem:[#allocation28_spill] sm:$0xff] %v2559_v58  ;;  %2995 = vst [vmem:[#allocation29_spill] sm:$0xff] %v2562_v59 }
 0x148   :  { %v245_v61 = vpop.f32.mrb[8].mxu0  ;;  %v318_v63 = vpop.f32.mrb[8].mxu1 }
 0x149   :  { %v2564_v3 = vadd.f32 %v245_v61, %v121_v54  ;;  %v247_v4 = vpop.f32.mrb[9].mxu0  ;;  %v2567_v6 = vadd.f32 %v318_v63, %v2526_v50  ;;  %v320_v26 = vpop.f32.mrb[9].mxu1 }
 0x14a   :  { %v2569_v43 = vadd.f32 %v247_v4, %v125_v57  ;;  %v249_v42 = vpop.f32.mrb[10].mxu0  ;;  %v2572_v45 = vadd.f32 %v320_v26, %v2532_v53  ;;  %v322_v47 = vpop.f32.mrb[10].mxu1 }
 0x14b   :  { %2996 = vst [vmem:[#allocation30_spill] sm:$0xff] %v2564_v3  ;;  %2997 = vst [vmem:[#allocation31_spill] sm:$0xff] %v2567_v6  ;;  %v2574_v1 = vadd.f32 %v249_v42, %v121_v54  ;;  %v251_v49 = vpop.f32.mrb[11].mxu0  ;;  %v2577_v59 = vadd.f32 %v322_v47, %v2526_v50  ;;  %v324_v61 = vpop.f32.mrb[11].mxu1 }
 0x14c   :  { %2998 = vst [vmem:[#allocation32_spill] sm:$0xff] %v2569_v43  ;;  %2999 = vst [vmem:[#allocation33_spill] sm:$0xff] %v2572_v45  ;;  %v2579_v3 = vadd.f32 %v251_v49, %v125_v57  ;;  %v2582_v63 = vadd.f32 %v324_v61, %v2532_v53 }
 0x14d   :  { %3000 = vst [vmem:[#allocation34_spill] sm:$0xff] %v2574_v1  ;;  %3001 = vst [vmem:[#allocation35_spill] sm:$0xff] %v2577_v59 }
 0x14e   :  { %3002 = vst [vmem:[#allocation36_spill] sm:$0xff] %v2579_v3  ;;  %3003 = vst [vmem:[#allocation37_spill] sm:$0xff] %v2582_v63 }
 0x150   :  { %v255_v6 = vpop.f32.mrb[12].mxu0  ;;  %v328_v4 = vpop.f32.mrb[12].mxu1 }
 0x151   :  { %v2584_v43 = vadd.f32 %v255_v6, %v121_v54  ;;  %v257_v58 = vpop.f32.mrb[13].mxu0  ;;  %v2587_v26 = vadd.f32 %v328_v4, %v2526_v50  ;;  %v330_v42 = vpop.f32.mrb[13].mxu1 }
 0x152   :  { %v2589_v1 = vadd.f32 %v257_v58, %v125_v57  ;;  %v259_v45 = vpop.f32.mrb[14].mxu0  ;;  %v2592_v47 = vadd.f32 %v330_v42, %v2532_v53  ;;  %v332_v49 = vpop.f32.mrb[14].mxu1  ;;  %v226_v58 = vadd.f32 %v2528_v51, %v121_v54  ;;  %v299_v42 = vadd.f32 %v2530_v52, %v2526_v50 }
 0x153   :  { %3004 = vst [vmem:[#allocation38_spill] sm:$0xff] %v2584_v43  ;;  %3005 = vst [vmem:[#allocation39_spill] sm:$0xff] %v2587_v26  ;;  %v2594_v3 = vadd.f32 %v259_v45, %v121_v54  ;;  %v261_v61 = vpop.f32.mrb[15].mxu0  ;;  %v2597_v63 = vadd.f32 %v332_v49, %v2526_v50  ;;  %v334_v6 = vpop.f32.mrb[15].mxu1  ;;  %v301_v45 = vadd.f32 %v300_v56, %v2532_v53 }
 0x154   :  { %3006 = vst [vmem:[#allocation40_spill] sm:$0xff] %v2589_v1  ;;  %3007 = vst [vmem:[#allocation41_spill] sm:$0xff] %v2592_v47  ;;  %v2599_v43 = vadd.f32 %v261_v61, %v125_v57  ;;  %v2602_v4 = vadd.f32 %v334_v6, %v2532_v53  ;;  %v228_v1 = vadd.f32 %v227_v55, %v125_v57 }
 0x155   :  { %3008 = vst [vmem:[#allocation42_spill] sm:$0xff] %v2594_v3  ;;  %3009 = vst [vmem:[#allocation43_spill] sm:$0xff] %v2597_v63 }
 0x156   :  { %3010 = vst [vmem:[#allocation44_spill] sm:$0xff] %v2599_v43  ;;  %3011 = vst [vmem:[#allocation45_spill] sm:$0xff] %v2602_v4 }
 0x158   :  { %v606_v47 = vpop.f32.mrb[16].mxu0 }
 0x159   :  { %v654_v3 = vadd.f32 %v606_v47, %v226_v58  ;;  %v647_v26 = vpop.f32.mrb[16].mxu1  ;;  %v608_v59 = vpop.f32.mrb[17].mxu0 }
 0x15a   :  { %v656_v49 = vadd.f32 %v647_v26, %v299_v42  ;;  %v655_v63 = vadd.f32 %v608_v59, %v228_v1  ;;  %v649_v48 = vpop.f32.mrb[17].mxu1  ;;  %v610_v61 = vpop.f32.mrb[18].mxu0 }
 0x15b   :  { %v1719_v43 = vmul.f32 -1.442695, %v654_v3  ;;  %v657_v46 = vadd.f32 %v649_v48, %v301_v45  ;;  %v611_v6 = vpop.f32.mrb[19].mxu0  ;;  %v651_v4 = vpop.f32.mrb[18].mxu1 }
 0x15c   :  { %v1720_v44 = vmul.f32 -1.442695, %v655_v63  ;;  %v652_v51 = vpop.f32.mrb[19].mxu1  ;;  %v3012_v4 = vmov 0  }
 0x15d   :  { %1896 = vpow2.f32 %v1719_v43  ;;  %v1721_v54 = vmul.f32 -1.442695, %v657_v46 }
 0x15e   :  { %1898 = vpow2.f32 %v1720_v44 }
 0x15f   :  { %1900 = vpow2.f32 %v1721_v54 }
 0x160   :  { %1902 = vtanh.f32 %v656_v49 }
 0x167   :  { %v1897_v50 = vpop.eup %1896 }
 0x168   :  { %v1899_v52 = vpop.eup %1898  ;;  %v661_v55 = vadd.f32 1.0, %v1897_v50 }
 0x169   :  { %v667_v53 = vadd.f32 1.0, %v1899_v52  ;;  %v1901_v1 = vpop.eup %1900 }
 0x16a   :  { %1904 = vrcp.f32 %v661_v55  ;;  %v1903_v56 = vpop.eup %1902  ;;  %v674_v3 = vadd.f32 1.0, %v1901_v1 }
 0x16b   :  { %1906 = vrcp.f32 %v667_v53 }
 0x16c   :  { %1908 = vrcp.f32 %v674_v3 }
 0x174   :  { %v1905_v57 = vpop.eup %1904 }
 0x175   :  { %v1907_v59 = vpop.eup %1906  ;;  %v678_v48 = vmul.f32 %v1905_v57, %v1903_v56 }
 0x176   :  { %v677_v26 = vmul.f32 0.0, %v1907_v59  ;;  %v1909_v44 = vpop.eup %1908 }
 0x178   :  { %v2608_v63 = vadd.f32 %v678_v48, %v677_v26 }
 0x17a   :  { %1910 = vtanh.f32 %v2608_v63 }
 0x184   :  { %v1911_v46 = vpop.eup %1910 }
 0x185   :  { %v2611_v43 = vmul.f32 %v1911_v46, %v1909_v44 }
 0x187   :  { %v690_v47 = vpack.c.bf16 %v2611_v43, %v2611_v43 }
 0x189   :  { %724 = vmatmul.mubr.bf16.vlgmr.msra.gmra.mrb[20].mxu0 %v690_v47  ;;  %765 = vmatmul.mubr.bf16.vlgmr.msra.gmra.mrb[20].mxu1 %v690_v47 }
 0x18a   :  { %811 = vmatpush1.bf16.msra.mxu0 %v2380_v9  ;;  %852 = vmatpush1.bf16.msra.mxu1 %v2383_v10 }
 0x18b   :  { %812 = vmatprep.subr.bf16.mxu0 %v2387_v11  ;;  %853 = vmatprep.subr.bf16.mxu1 %v2391_v12 }
 0x18c   :  { %842 = vmatprep.mubr.bf16.mxu0 %v3012_v4  ;;  %883 = vmatprep.mubr.bf16.mxu1 %v3012_v4 }
 0x18e   :  { %813 = vmatpush1.bf16.msra.mxu0 %v2393_v13  ;;  %854 = vmatpush1.bf16.msra.mxu1 %v2395_v14 }
 0x18f   :  { %814 = vmatprep.subr.bf16.mxu0 %v2401_v16  ;;  %855 = vmatprep.subr.bf16.mxu1 %v2404_v17 }
 0x192   :  { %815 = vmatpush1.bf16.msra.mxu0 %v2407_v18  ;;  %856 = vmatpush1.bf16.msra.mxu1 %v2409_v19 }
 0x193   :  { %816 = vmatprep.subr.bf16.mxu0 %v2413_v20  ;;  %857 = vmatprep.subr.bf16.mxu1 %v2416_v21 }
 0x196   :  { %817 = vmatpush1.bf16.msra.mxu0 %v2420_v22  ;;  %858 = vmatpush1.bf16.msra.mxu1 %v2423_v23 }
 0x197   :  { %818 = vmatprep.subr.bf16.mxu0 %v2428_v24  ;;  %859 = vmatprep.subr.bf16.mxu1 %v2432_v25 }
 0x19a   :  { %819 = vmatpush1.bf16.msra.mxu0 %v2435_v27  ;;  %860 = vmatpush1.bf16.msra.mxu1 %v2439_v28 }
 0x19b   :  { %820 = vmatprep.subr.bf16.mxu0 %v2441_v29  ;;  %861 = vmatprep.subr.bf16.mxu1 %v2444_v30 }
 0x19e   :  { %821 = vmatpush1.bf16.msra.mxu0 %v2449_v31  ;;  %862 = vmatpush1.bf16.msra.mxu1 %v2451_v32 }
 0x19f   :  { %822 = vmatprep.subr.bf16.mxu0 %v2456_v33  ;;  %863 = vmatprep.subr.bf16.mxu1 %v2460_v34 }
 0x1a2   :  { %823 = vmatpush1.bf16.msra.mxu0 %v2463_v36  ;;  %864 = vmatpush1.bf16.msra.mxu1 %v2467_v37 }
 0x1a3   :  { %824 = vmatprep.subr.bf16.mxu0 %v2469_v38  ;;  %865 = vmatprep.subr.bf16.mxu1 %v2472_v39 }
 0x1a6   :  { %825 = vmatpush1.bf16.msra.mxu0 %v2477_v40  ;;  %866 = vmatpush1.bf16.msra.mxu1 %v2482_v41 }
 0x1a7   :  { %929 = vmatprep.subr.bf16.mxu0 %v2376_v7  ;;  %970 = vmatprep.subr.bf16.mxu1 %v2378_v8 }
 0x25c   :  { %v725_v58 = vpop.f32.mrb[20].mxu0  ;;  %v766_v42 = vpop.f32.mrb[20].mxu1 }
 0x25d   :  { %v773_v45 = vadd.f32 %v725_v58, %v2534_v60  ;;  %v775_v49 = vadd.f32 %v766_v42, %v2537_v62  ;;  %v727_v61 = vpop.f32.mrb[21].mxu0  ;;  %v768_v6 = vpop.f32.mrb[21].mxu1 }
 0x25e   :  { %v774_v51 = vadd.f32 %v727_v61, %v2539_v0  ;;  %v776_v54 = vadd.f32 %v768_v6, %v2542_v2  ;;  %v729_v50 = vpop.f32.mrb[22].mxu0  ;;  %v770_v52 = vpop.f32.mrb[22].mxu1 }
 0x25f   :  { %v1722_v55 = vmul.f32 -1.442695, %v773_v45  ;;  %v730_v53 = vpop.f32.mrb[23].mxu0  ;;  %v771_v1 = vpop.f32.mrb[23].mxu1 }
 0x260   :  { %v1723_v56 = vmul.f32 -1.442695, %v774_v51  ;;  %v1724_v57 = vmul.f32 -1.442695, %v776_v54  ;;  %v3013_v53 = vld [vmem:[#allocation25_spill] sm:$0xff] }
 0x261   :  { %1912 = vpow2.f32 %v1722_v55 }
 0x262   :  { %1914 = vpow2.f32 %v1723_v56 }
 0x263   :  { %1916 = vpow2.f32 %v1724_v57 }
 0x264   :  { %1918 = vtanh.f32 %v775_v49 }
 0x26b   :  { %v1913_v59 = vpop.eup %1912 }
 0x26c   :  { %v1915_v48 = vpop.eup %1914  ;;  %v780_v60 = vadd.f32 1.0, %v1913_v59 }
 0x26d   :  { %v786_v62 = vadd.f32 1.0, %v1915_v48  ;;  %v1917_v0 = vpop.eup %1916 }
 0x26e   :  { %1920 = vrcp.f32 %v780_v60  ;;  %v1919_v3 = vpop.eup %1918  ;;  %v793_v46 = vadd.f32 1.0, %v1917_v0 }
 0x26f   :  { %1922 = vrcp.f32 %v786_v62 }
 0x270   :  { %1924 = vrcp.f32 %v793_v46 }
 0x278   :  { %v1921_v2 = vpop.eup %1920 }
 0x279   :  { %v1923_v26 = vpop.eup %1922  ;;  %v797_v44 = vmul.f32 %v1921_v2, %v1919_v3 }
 0x27a   :  { %v796_v47 = vmul.f32 %v1923_v26, %v2608_v63  ;;  %v1925_v42 = vpop.eup %1924 }
 0x27c   :  { %v2654_v58 = vadd.f32 %v797_v44, %v796_v47 }
 0x27e   :  { %1926 = vtanh.f32 %v2654_v58 }
 0x288   :  { %v1927_v45 = vpop.eup %1926 }
 0x289   :  { %v2657_v61 = vmul.f32 %v1927_v45, %v1925_v42 }
 0x28b   :  { %v809_v49 = vpack.c.bf16 %v2657_v61, %v2657_v61 }
 0x28d   :  { %843 = vmatmul.mubr.bf16.vlgmr.msra.gmra.mrb[24].mxu0 %v809_v49  ;;  %884 = vmatmul.mubr.bf16.vlgmr.msra.gmra.mrb[24].mxu1 %v809_v49 }
 0x28e   :  { %930 = vmatpush1.bf16.msra.mxu0 %v2380_v9  ;;  %971 = vmatpush1.bf16.msra.mxu1 %v2383_v10 }
 0x28f   :  { %931 = vmatprep.subr.bf16.mxu0 %v2387_v11  ;;  %972 = vmatprep.subr.bf16.mxu1 %v2391_v12 }
 0x290   :  { %961 = vmatprep.mubr.bf16.mxu0 %v3012_v4  ;;  %1002 = vmatprep.mubr.bf16.mxu1 %v3012_v4 }
 0x292   :  { %932 = vmatpush1.bf16.msra.mxu0 %v2393_v13  ;;  %973 = vmatpush1.bf16.msra.mxu1 %v2395_v14 }
 0x293   :  { %933 = vmatprep.subr.bf16.mxu0 %v2401_v16  ;;  %974 = vmatprep.subr.bf16.mxu1 %v2404_v17 }
 0x296   :  { %934 = vmatpush1.bf16.msra.mxu0 %v2407_v18  ;;  %975 = vmatpush1.bf16.msra.mxu1 %v2409_v19 }
 0x297   :  { %935 = vmatprep.subr.bf16.mxu0 %v2413_v20  ;;  %976 = vmatprep.subr.bf16.mxu1 %v2416_v21 }
 0x29a   :  { %936 = vmatpush1.bf16.msra.mxu0 %v2420_v22  ;;  %977 = vmatpush1.bf16.msra.mxu1 %v2423_v23 }
 0x29b   :  { %937 = vmatprep.subr.bf16.mxu0 %v2428_v24  ;;  %978 = vmatprep.subr.bf16.mxu1 %v2432_v25 }
 0x29e   :  { %938 = vmatpush1.bf16.msra.mxu0 %v2435_v27  ;;  %979 = vmatpush1.bf16.msra.mxu1 %v2439_v28 }
 0x29f   :  { %939 = vmatprep.subr.bf16.mxu0 %v2441_v29  ;;  %980 = vmatprep.subr.bf16.mxu1 %v2444_v30 }
 0x2a2   :  { %940 = vmatpush1.bf16.msra.mxu0 %v2449_v31  ;;  %981 = vmatpush1.bf16.msra.mxu1 %v2451_v32 }
 0x2a3   :  { %941 = vmatprep.subr.bf16.mxu0 %v2456_v33  ;;  %982 = vmatprep.subr.bf16.mxu1 %v2460_v34 }
 0x2a6   :  { %942 = vmatpush1.bf16.msra.mxu0 %v2463_v36  ;;  %983 = vmatpush1.bf16.msra.mxu1 %v2467_v37 }
 0x2a7   :  { %943 = vmatprep.subr.bf16.mxu0 %v2469_v38  ;;  %984 = vmatprep.subr.bf16.mxu1 %v2472_v39 }
 0x2aa   :  { %944 = vmatpush1.bf16.msra.mxu0 %v2477_v40  ;;  %985 = vmatpush1.bf16.msra.mxu1 %v2482_v41 }
 0x2ab   :  { %1048 = vmatprep.subr.bf16.mxu0 %v2376_v7  ;;  %1089 = vmatprep.subr.bf16.mxu1 %v2378_v8 }
 0x360   :  { %v844_v63 = vpop.f32.mrb[24].mxu0  ;;  %v885_v6 = vpop.f32.mrb[24].mxu1 }
 0x361   :  { %v892_v51 = vadd.f32 %v844_v63, %v2544_v5  ;;  %v894_v54 = vadd.f32 %v885_v6, %v2547_v15  ;;  %v846_v50 = vpop.f32.mrb[25].mxu0  ;;  %v887_v52 = vpop.f32.mrb[25].mxu1 }
 0x362   :  { %v893_v55 = vadd.f32 %v846_v50, %v2549_v35  ;;  %v895_v1 = vadd.f32 %v887_v52, %v3013_v53  ;;  %v848_v56 = vpop.f32.mrb[26].mxu0  ;;  %v889_v57 = vpop.f32.mrb[26].mxu1  ;;  %v3015_v53 = vld [vmem:[#allocation27_spill] sm:$0xff] }
 0x363   :  { %v1725_v59 = vmul.f32 -1.442695, %v892_v51  ;;  %v849_v48 = vpop.f32.mrb[27].mxu0  ;;  %v890_v60 = vpop.f32.mrb[27].mxu1  ;;  %v801_v51 = vadd.f32 %v2657_v61, %v2611_v43  ;;  %v3014_v61 = vld [vmem:[#allocation26_spill] sm:$0xff] }
 0x364   :  { %v1726_v62 = vmul.f32 -1.442695, %v893_v55  ;;  %v1727_v0 = vmul.f32 -1.442695, %v895_v1  ;;  %v3017_v60 = vld [vmem:[#allocation29_spill] sm:$0xff] }
 0x365   :  { %1928 = vpow2.f32 %v1725_v59  ;;  %v3016_v59 = vld [vmem:[#allocation28_spill] sm:$0xff] }
 0x366   :  { %1930 = vpow2.f32 %v1726_v62 }
 0x367   :  { %1932 = vpow2.f32 %v1727_v0 }
 0x368   :  { %1934 = vtanh.f32 %v894_v54 }
 0x36f   :  { %v1929_v3 = vpop.eup %1928 }
 0x370   :  { %v1931_v2 = vpop.eup %1930  ;;  %v899_v5 = vadd.f32 1.0, %v1929_v3 }
 0x371   :  { %v905_v15 = vadd.f32 1.0, %v1931_v2  ;;  %v1933_v35 = vpop.eup %1932 }
 0x372   :  { %1936 = vrcp.f32 %v899_v5  ;;  %v1935_v26 = vpop.eup %1934  ;;  %v912_v42 = vadd.f32 1.0, %v1933_v35 }
 0x373   :  { %1938 = vrcp.f32 %v905_v15 }
 0x374   :  { %1940 = vrcp.f32 %v912_v42 }
 0x37c   :  { %v1937_v44 = vpop.eup %1936 }
 0x37d   :  { %v1939_v46 = vpop.eup %1938  ;;  %v916_v47 = vmul.f32 %v1937_v44, %v1935_v26 }
 0x37e   :  { %v915_v45 = vmul.f32 %v1939_v46, %v2654_v58  ;;  %v1941_v63 = vpop.eup %1940 }
 0x380   :  { %v2700_v49 = vadd.f32 %v916_v47, %v915_v45 }
 0x382   :  { %1942 = vtanh.f32 %v2700_v49 }
 0x38c   :  { %v1943_v6 = vpop.eup %1942 }
 0x38d   :  { %v919_v54 = vmul.f32 %v1943_v6, %v1941_v63 }
 0x38f   :  { %v2705_v50 = vadd.f32 %v919_v54, %v801_v51  ;;  %v928_v52 = vpack.c.bf16 %v919_v54, %v919_v54 }
 0x391   :  { %962 = vmatmul.mubr.bf16.vlgmr.msra.gmra.mrb[28].mxu0 %v928_v52  ;;  %1003 = vmatmul.mubr.bf16.vlgmr.msra.gmra.mrb[28].mxu1 %v928_v52 }
 0x392   :  { %1049 = vmatpush1.bf16.msra.mxu0 %v2380_v9  ;;  %1090 = vmatpush1.bf16.msra.mxu1 %v2383_v10 }
 0x393   :  { %1050 = vmatprep.subr.bf16.mxu0 %v2387_v11  ;;  %1091 = vmatprep.subr.bf16.mxu1 %v2391_v12 }
 0x394   :  { %1080 = vmatprep.mubr.bf16.mxu0 %v3012_v4  ;;  %1121 = vmatprep.mubr.bf16.mxu1 %v3012_v4 }
 0x396   :  { %1051 = vmatpush1.bf16.msra.mxu0 %v2393_v13  ;;  %1092 = vmatpush1.bf16.msra.mxu1 %v2395_v14 }
 0x397   :  { %1052 = vmatprep.subr.bf16.mxu0 %v2401_v16  ;;  %1093 = vmatprep.subr.bf16.mxu1 %v2404_v17 }
 0x39a   :  { %1053 = vmatpush1.bf16.msra.mxu0 %v2407_v18  ;;  %1094 = vmatpush1.bf16.msra.mxu1 %v2409_v19 }
 0x39b   :  { %1054 = vmatprep.subr.bf16.mxu0 %v2413_v20  ;;  %1095 = vmatprep.subr.bf16.mxu1 %v2416_v21 }
 0x39e   :  { %1055 = vmatpush1.bf16.msra.mxu0 %v2420_v22  ;;  %1096 = vmatpush1.bf16.msra.mxu1 %v2423_v23 }
 0x39f   :  { %1056 = vmatprep.subr.bf16.mxu0 %v2428_v24  ;;  %1097 = vmatprep.subr.bf16.mxu1 %v2432_v25 }
 0x3a2   :  { %1057 = vmatpush1.bf16.msra.mxu0 %v2435_v27  ;;  %1098 = vmatpush1.bf16.msra.mxu1 %v2439_v28 }
 0x3a3   :  { %1058 = vmatprep.subr.bf16.mxu0 %v2441_v29  ;;  %1099 = vmatprep.subr.bf16.mxu1 %v2444_v30 }
 0x3a6   :  { %1059 = vmatpush1.bf16.msra.mxu0 %v2449_v31  ;;  %1100 = vmatpush1.bf16.msra.mxu1 %v2451_v32 }
 0x3a7   :  { %1060 = vmatprep.subr.bf16.mxu0 %v2456_v33  ;;  %1101 = vmatprep.subr.bf16.mxu1 %v2460_v34 }
 0x3aa   :  { %1061 = vmatpush1.bf16.msra.mxu0 %v2463_v36  ;;  %1102 = vmatpush1.bf16.msra.mxu1 %v2467_v37 }
 0x3ab   :  { %1062 = vmatprep.subr.bf16.mxu0 %v2469_v38  ;;  %1103 = vmatprep.subr.bf16.mxu1 %v2472_v39 }
 0x3ae   :  { %1063 = vmatpush1.bf16.msra.mxu0 %v2477_v40  ;;  %1104 = vmatpush1.bf16.msra.mxu1 %v2482_v41 }
 0x3af   :  { %1167 = vmatprep.subr.bf16.mxu0 %v2376_v7  ;;  %1208 = vmatprep.subr.bf16.mxu1 %v2378_v8 }
 0x464   :  { %v963_v43 = vpop.f32.mrb[28].mxu0  ;;  %v1004_v58 = vpop.f32.mrb[28].mxu1 }
 0x465   :  { %v1011_v55 = vadd.f32 %v963_v43, %v3014_v61  ;;  %v1013_v1 = vadd.f32 %v1004_v58, %v3015_v53  ;;  %v965_v56 = vpop.f32.mrb[29].mxu0  ;;  %v1006_v57 = vpop.f32.mrb[29].mxu1 }
 0x466   :  { %v1012_v48 = vadd.f32 %v965_v56, %v3016_v59  ;;  %v1014_v62 = vadd.f32 %v1006_v57, %v3017_v60  ;;  %v967_v0 = vpop.f32.mrb[30].mxu0  ;;  %v1008_v3 = vpop.f32.mrb[30].mxu1 }
 0x467   :  { %v1728_v2 = vmul.f32 -1.442695, %v1011_v55  ;;  %v968_v5 = vpop.f32.mrb[31].mxu0  ;;  %v1009_v15 = vpop.f32.mrb[31].mxu1 }
 0x468   :  { %v1729_v7 = vmul.f32 -1.442695, %v1012_v48  ;;  %v1730_v8 = vmul.f32 -1.442695, %v1014_v62 }
 0x469   :  { %1944 = vpow2.f32 %v1728_v2 }
 0x46a   :  { %1946 = vpow2.f32 %v1729_v7 }
 0x46b   :  { %1948 = vpow2.f32 %v1730_v8  ;;  %v2801_v8 = vld [vmem:[#allocation12] ss:$16 sps:$4 sm:$0xff]  }
 0x46c   :  { %1950 = vtanh.f32 %v1013_v1 }
 0x473   :  { %v1945_v35 = vpop.eup %1944 }
 0x474   :  { %v1947_v26 = vpop.eup %1946  ;;  %v1018_v44 = vadd.f32 1.0, %v1945_v35  ;;  %v2804_v35 = vld [vmem:[#allocation12 + $0x8] ss:$16 sps:$4 sm:$0xff]  }
 0x475   :  { %v1024_v46 = vadd.f32 1.0, %v1947_v26  ;;  %v1949_v47 = vpop.eup %1948  ;;  %v2807_v26 = vld [vmem:[#allocation12 + $0x24] ss:$16 sps:$4 sm:$0xff]  }
 0x476   :  { %1952 = vrcp.f32 %v1018_v44  ;;  %v1951_v42 = vpop.eup %1950  ;;  %v1031_v51 = vadd.f32 1.0, %v1949_v47  ;;  %v2810_v44 = vld [vmem:[#allocation12 + $0x2c] ss:$16 sps:$4 sm:$0xff]   ;;  %v2818_v47 = vld [vmem:[#allocation12 + $0x28] ss:$16 sps:$4 sm:$0xff]  }
 0x477   :  { %1954 = vrcp.f32 %v1024_v46  ;;  %v2815_v46 = vld [vmem:[#allocation12 + $0x20] ss:$16 sps:$4 sm:$0xff]  }
 0x478   :  { %1956 = vrcp.f32 %v1031_v51  ;;  %v2833_v51 = vld [vmem:[#allocation12 + $0x64] ss:$16 sps:$4 sm:$0xff]  }
 0x480   :  { %v1953_v45 = vpop.eup %1952 }
 0x481   :  { %v1955_v63 = vpop.eup %1954  ;;  %v1035_v6 = vmul.f32 %v1953_v45, %v1951_v42  ;;  %v2821_v42 = vld [vmem:[#allocation12 + $0x44] ss:$16 sps:$4 sm:$0xff]   ;;  %v2824_v45 = vld [vmem:[#allocation12 + $0x4c] ss:$16 sps:$4 sm:$0xff]  }
 0x482   :  { %v1034_v54 = vmul.f32 %v1955_v63, %v2700_v49  ;;  %v1957_v43 = vpop.eup %1956  ;;  %v2827_v63 = vld [vmem:[#allocation12 + $0x40] ss:$16 sps:$4 sm:$0xff]  }
 0x484   :  { %v2746_v52 = vadd.f32 %v1035_v6, %v1034_v54  ;;  %v2830_v6 = vld [vmem:[#allocation12 + $0x48] ss:$16 sps:$4 sm:$0xff]   ;;  %v2836_v54 = vld [vmem:[#allocation12 + $0x6c] ss:$16 sps:$4 sm:$0xff]  }
 0x486   :  { %1958 = vtanh.f32 %v2746_v52 }
 0x490   :  { %v1959_v58 = vpop.eup %1958 }
 0x491   :  { %v1038_v61 = vmul.f32 %v1959_v58, %v1957_v43  ;;  %v2842_v43 = vld [vmem:[#allocation12 + $0x68] ss:$16 sps:$4 sm:$0xff]   ;;  %v2845_v58 = vld [vmem:[#allocation12 + $0x84] ss:$16 sps:$4 sm:$0xff]  }
 0x493   :  { %v2750_v55 = vadd.f32 %v1038_v61, %v2705_v50  ;;  %v1047_v53 = vpack.c.bf16 %v1038_v61, %v1038_v61  ;;  %v2848_v61 = vld [vmem:[#allocation12 + $0x8c] ss:$16 sps:$4 sm:$0xff]  }
 0x495   :  { %1081 = vmatmul.mubr.bf16.vlgmr.msra.gmra.mrb[32].mxu0 %v1047_v53  ;;  %1122 = vmatmul.mubr.bf16.vlgmr.msra.gmra.mrb[32].mxu1 %v1047_v53  ;;  %v2854_v53 = vld [vmem:[#allocation12 + $0x88] ss:$16 sps:$4 sm:$0xff]  }
 0x496   :  { %1168 = vmatpush1.bf16.msra.mxu0 %v2380_v9  ;;  %1209 = vmatpush1.bf16.msra.mxu1 %v2383_v10  ;;  %v2784_v9 = vld [vmem:[#allocation12 + $0x4] ss:$16 sps:$4 sm:$0xff]   ;;  %v2787_v10 = vld [vmem:[#allocation12 + $0xc] ss:$16 sps:$4 sm:$0xff]  }
 0x497   :  { %1169 = vmatprep.subr.bf16.mxu0 %v2387_v11  ;;  %1210 = vmatprep.subr.bf16.mxu1 %v2391_v12 }
 0x498   :  { %1199 = vmatprep.mubr.bf16.mxu0 %v3012_v4  ;;  %1240 = vmatprep.mubr.bf16.mxu1 %v3012_v4 }
 0x49a   :  { %1170 = vmatpush1.bf16.msra.mxu0 %v2393_v13  ;;  %1211 = vmatpush1.bf16.msra.mxu1 %v2395_v14  ;;  %v3018_v13 = vld [vmem:[#allocation30_spill] sm:$0xff] }
 0x49b   :  { %1171 = vmatprep.subr.bf16.mxu0 %v2401_v16  ;;  %1212 = vmatprep.subr.bf16.mxu1 %v2404_v17  ;;  %v3019_v16 = vld [vmem:[#allocation31_spill] sm:$0xff] }
 0x49e   :  { %1172 = vmatpush1.bf16.msra.mxu0 %v2407_v18  ;;  %1213 = vmatpush1.bf16.msra.mxu1 %v2409_v19 }
 0x49f   :  { %1173 = vmatprep.subr.bf16.mxu0 %v2413_v20  ;;  %1214 = vmatprep.subr.bf16.mxu1 %v2416_v21  ;;  %v3020_v20 = vld [vmem:[#allocation32_spill] sm:$0xff] }
 0x4a2   :  { %1174 = vmatpush1.bf16.msra.mxu0 %v2420_v22  ;;  %1215 = vmatpush1.bf16.msra.mxu1 %v2423_v23  ;;  %v3021_v22 = vld [vmem:[#allocation33_spill] sm:$0xff] }
 0x4a3   :  { %1175 = vmatprep.subr.bf16.mxu0 %v2428_v24  ;;  %1216 = vmatprep.subr.bf16.mxu1 %v2432_v25 }
 0x4a6   :  { %1176 = vmatpush1.bf16.msra.mxu0 %v2435_v27  ;;  %1217 = vmatpush1.bf16.msra.mxu1 %v2439_v28 }
 0x4a7   :  { %1177 = vmatprep.subr.bf16.mxu0 %v2441_v29  ;;  %1218 = vmatprep.subr.bf16.mxu1 %v2444_v30 }
 0x4aa   :  { %1178 = vmatpush1.bf16.msra.mxu0 %v2449_v31  ;;  %1219 = vmatpush1.bf16.msra.mxu1 %v2451_v32 }
 0x4ab   :  { %1179 = vmatprep.subr.bf16.mxu0 %v2456_v33  ;;  %1220 = vmatprep.subr.bf16.mxu1 %v2460_v34 }
 0x4ae   :  { %1180 = vmatpush1.bf16.msra.mxu0 %v2463_v36  ;;  %1221 = vmatpush1.bf16.msra.mxu1 %v2467_v37 }
 0x4af   :  { %1181 = vmatprep.subr.bf16.mxu0 %v2469_v38  ;;  %1222 = vmatprep.subr.bf16.mxu1 %v2472_v39 }
 0x4b2   :  { %1182 = vmatpush1.bf16.msra.mxu0 %v2477_v40  ;;  %1223 = vmatpush1.bf16.msra.mxu1 %v2482_v41 }
 0x4b3   :  { %1286 = vmatprep.subr.bf16.mxu0 %v2784_v9  ;;  %1327 = vmatprep.subr.bf16.mxu1 %v2787_v10 }
 0x568   :  { %v1082_v11 = vpop.f32.mrb[32].mxu0  ;;  %v1123_v12 = vpop.f32.mrb[32].mxu1 }
 0x569   :  { %v1130_v14 = vadd.f32 %v1082_v11, %v3018_v13  ;;  %v1132_v17 = vadd.f32 %v1123_v12, %v3019_v16  ;;  %v1084_v18 = vpop.f32.mrb[33].mxu0  ;;  %v1125_v19 = vpop.f32.mrb[33].mxu1  ;;  %v2857_v11 = vld [vmem:[#allocation12 + $0xa4] ss:$16 sps:$4 sm:$0xff]   ;;  %v2860_v12 = vld [vmem:[#allocation12 + $0xac] ss:$16 sps:$4 sm:$0xff]  }
 0x56a   :  { %v1131_v21 = vadd.f32 %v1084_v18, %v3020_v20  ;;  %v1133_v23 = vadd.f32 %v1125_v19, %v3021_v22  ;;  %v1086_v24 = vpop.f32.mrb[34].mxu0  ;;  %v1127_v25 = vpop.f32.mrb[34].mxu1  ;;  %v2863_v13 = vld [vmem:[#allocation12 + $0xa0] ss:$16 sps:$4 sm:$0xff]   ;;  %v2869_v16 = vld [vmem:[#allocation12 + $0xc4] ss:$16 sps:$4 sm:$0xff]  }
 0x56b   :  { %v1731_v27 = vmul.f32 -1.442695, %v1130_v14  ;;  %v1087_v28 = vpop.f32.mrb[35].mxu0  ;;  %v1128_v29 = vpop.f32.mrb[35].mxu1  ;;  %v2866_v14 = vld [vmem:[#allocation12 + $0xa8] ss:$16 sps:$4 sm:$0xff]  }
 0x56c   :  { %v1732_v30 = vmul.f32 -1.442695, %v1131_v21  ;;  %v1733_v31 = vmul.f32 -1.442695, %v1133_v23  ;;  %v3022_v19 = vld [vmem:[#allocation34_spill] sm:$0xff]  ;;  %v3023_v20 = vld [vmem:[#allocation35_spill] sm:$0xff] }
 0x56d   :  { %1960 = vpow2.f32 %v1731_v27  ;;  %v3024_v22 = vld [vmem:[#allocation36_spill] sm:$0xff]  ;;  %v3025_v23 = vld [vmem:[#allocation37_spill] sm:$0xff] }
 0x56e   :  { %1962 = vpow2.f32 %v1732_v30 }
 0x56f   :  { %1964 = vpow2.f32 %v1733_v31 }
 0x570   :  { %1966 = vtanh.f32 %v1132_v17 }
 0x577   :  { %v1961_v32 = vpop.eup %1960 }
 0x578   :  { %v1963_v33 = vpop.eup %1962  ;;  %v1137_v49 = vadd.f32 1.0, %v1961_v32 }
 0x579   :  { %v1143_v50 = vadd.f32 1.0, %v1963_v33  ;;  %v1965_v1 = vpop.eup %1964 }
 0x57a   :  { %1968 = vrcp.f32 %v1137_v49  ;;  %v1967_v56 = vpop.eup %1966  ;;  %v1150_v60 = vadd.f32 1.0, %v1965_v1 }
 0x57b   :  { %1970 = vrcp.f32 %v1143_v50 }
 0x57c   :  { %1972 = vrcp.f32 %v1150_v60 }
 0x584   :  { %v1969_v57 = vpop.eup %1968 }
 0x585   :  { %v1971_v59 = vpop.eup %1970  ;;  %v1154_v48 = vmul.f32 %v1969_v57, %v1967_v56 }
 0x586   :  { %v1153_v62 = vmul.f32 %v1971_v59, %v2746_v52  ;;  %v1973_v3 = vpop.eup %1972  ;;  %v2839_v52 = vld [vmem:[#allocation12 + $0x60] ss:$16 sps:$4 sm:$0xff]  }
 0x588   :  { %v2795_v0 = vadd.f32 %v1154_v48, %v1153_v62 }
 0x58a   :  { %1974 = vtanh.f32 %v2795_v0 }
 0x594   :  { %v1975_v2 = vpop.eup %1974 }
 0x595   :  { %v1157_v5 = vmul.f32 %v1975_v2, %v1973_v3 }
 0x597   :  { %v2799_v15 = vadd.f32 %v1157_v5, %v2750_v55  ;;  %v1166_v7 = vpack.c.bf16 %v1157_v5, %v1157_v5  ;;  %v2851_v55 = vld [vmem:[#allocation12 + $0x80] ss:$16 sps:$4 sm:$0xff]   ;;  %v2051_v5 = vld [vmem:[#allocation12 + $0xc8] ss:$16 sps:$4 sm:$0xff]  }
 0x599   :  { %1200 = vmatmul.mubr.bf16.vlgmr.msra.gmra.mrb[36].mxu0 %v1166_v7  ;;  %1241 = vmatmul.mubr.bf16.vlgmr.msra.gmra.mrb[36].mxu1 %v1166_v7  ;;  %v2053_v7 = vld [vmem:[#allocation12 + $0xec] ss:$16 sps:$4 sm:$0xff]  }
 0x59a   :  { %1287 = vmatpush1.bf16.msra.mxu0 %v2801_v8  ;;  %1328 = vmatpush1.bf16.msra.mxu1 %v2804_v35 }
 0x59b   :  { %1288 = vmatprep.subr.bf16.mxu0 %v2807_v26  ;;  %1329 = vmatprep.subr.bf16.mxu1 %v2810_v44 }
 0x59c   :  { %1318 = vmatprep.mubr.bf16.mxu0 %v3012_v4  ;;  %1359 = vmatprep.mubr.bf16.mxu1 %v3012_v4 }
 0x59e   :  { %1289 = vmatpush1.bf16.msra.mxu0 %v2815_v46  ;;  %1330 = vmatpush1.bf16.msra.mxu1 %v2818_v47 }
 0x59f   :  { %1290 = vmatprep.subr.bf16.mxu0 %v2821_v42  ;;  %1331 = vmatprep.subr.bf16.mxu1 %v2824_v45 }
 0x5a2   :  { %1291 = vmatpush1.bf16.msra.mxu0 %v2827_v63  ;;  %1332 = vmatpush1.bf16.msra.mxu1 %v2830_v6 }
 0x5a3   :  { %1292 = vmatprep.subr.bf16.mxu0 %v2833_v51  ;;  %1333 = vmatprep.subr.bf16.mxu1 %v2836_v54 }
 0x5a6   :  { %1293 = vmatpush1.bf16.msra.mxu0 %v2839_v52  ;;  %1334 = vmatpush1.bf16.msra.mxu1 %v2842_v43 }
 0x5a7   :  { %1294 = vmatprep.subr.bf16.mxu0 %v2845_v58  ;;  %1335 = vmatprep.subr.bf16.mxu1 %v2848_v61 }
 0x5aa   :  { %1295 = vmatpush1.bf16.msra.mxu0 %v2851_v55  ;;  %1336 = vmatpush1.bf16.msra.mxu1 %v2854_v53 }
 0x5ab   :  { %1296 = vmatprep.subr.bf16.mxu0 %v2857_v11  ;;  %1337 = vmatprep.subr.bf16.mxu1 %v2860_v12 }
 0x5ae   :  { %1297 = vmatpush1.bf16.msra.mxu0 %v2863_v13  ;;  %1338 = vmatpush1.bf16.msra.mxu1 %v2866_v14 }
 0x5af   :  { %1298 = vmatprep.subr.bf16.mxu0 %v2869_v16  ;;  %1339 = vmatprep.subr.bf16.mxu1 %v2460_v34 }
 0x5b2   :  { %1299 = vmatpush1.bf16.msra.mxu0 %v2463_v36  ;;  %1340 = vmatpush1.bf16.msra.mxu1 %v2467_v37 }
 0x5b3   :  { %1300 = vmatprep.subr.bf16.mxu0 %v2469_v38  ;;  %1341 = vmatprep.subr.bf16.mxu1 %v2472_v39 }
 0x5b6   :  { %1301 = vmatpush1.bf16.msra.mxu0 %v2477_v40  ;;  %1342 = vmatpush1.bf16.msra.mxu1 %v2482_v41 }
 0x5b7   :  { %1405 = vmatprep.subr.bf16.mxu0 %v2784_v9  ;;  %1446 = vmatprep.subr.bf16.mxu1 %v2787_v10 }
 0x66c   :  { %v1201_v17 = vpop.f32.mrb[36].mxu0  ;;  %v1242_v18 = vpop.f32.mrb[36].mxu1 }
 0x66d   :  { %v1249_v34 = vadd.f32 %v1201_v17, %v3022_v19  ;;  %v1251_v36 = vadd.f32 %v1242_v18, %v3023_v20  ;;  %v1203_v21 = vpop.f32.mrb[37].mxu0  ;;  %v1244_v37 = vpop.f32.mrb[37].mxu1 }
 0x66e   :  { %v1250_v38 = vadd.f32 %v1203_v21, %v3024_v22  ;;  %v1252_v39 = vadd.f32 %v1244_v37, %v3025_v23  ;;  %v1205_v24 = vpop.f32.mrb[38].mxu0  ;;  %v1246_v40 = vpop.f32.mrb[38].mxu1 }
 0x66f   :  { %v1734_v25 = vmul.f32 -1.442695, %v1249_v34  ;;  %v1206_v41 = vpop.f32.mrb[39].mxu0  ;;  %v1247_v27 = vpop.f32.mrb[39].mxu1 }
 0x670   :  { %v1735_v9 = vmul.f32 -1.442695, %v1250_v38  ;;  %v1736_v10 = vmul.f32 -1.442695, %v1252_v39  ;;  %v1523_v27 = vld [vmem:[#allocation15] sm:$0xff] }
 0x671   :  { %1976 = vpow2.f32 %v1734_v25 }
 0x672   :  { %1978 = vpow2.f32 %v1735_v9  ;;  %v1524_v9 = vld [vmem:[#allocation15 + $0x8] sm:$0xff] }
 0x673   :  { %1980 = vpow2.f32 %v1736_v10  ;;  %v1797_v10 = vpack.c.bf16 %v1524_v9, %v1523_v27 }
 0x674   :  { %1982 = vtanh.f32 %v1251_v36 }
 0x67b   :  { %v1977_v28 = vpop.eup %1976 }
 0x67c   :  { %v1979_v29 = vpop.eup %1978  ;;  %v1256_v30 = vadd.f32 1.0, %v1977_v28  ;;  %v1525_v28 = vld [vmem:[#allocation15 + $0x10] sm:$0xff] }
 0x67d   :  { %v1262_v31 = vadd.f32 1.0, %v1979_v29  ;;  %v1981_v32 = vpop.eup %1980  ;;  %v1526_v29 = vld [vmem:[#allocation15 + $0x18] sm:$0xff] }
 0x67e   :  { %1984 = vrcp.f32 %v1256_v30  ;;  %v1983_v33 = vpop.eup %1982  ;;  %v1269_v56 = vadd.f32 1.0, %v1981_v32  ;;  %v1800_v30 = vpack.c.bf16 %v1526_v29, %v1525_v28  ;;  %v1528_v32 = vld [vmem:[#allocation15 + $0x28] sm:$0xff] }
 0x67f   :  { %1986 = vrcp.f32 %v1262_v31  ;;  %v1527_v31 = vld [vmem:[#allocation15 + $0x20] sm:$0xff] }
 0x680   :  { %1988 = vrcp.f32 %v1269_v56  ;;  %v1531_v56 = vld [vmem:[#allocation15 + $0x40] sm:$0xff] }
 0x688   :  { %v1985_v49 = vpop.eup %1984 }
 0x689   :  { %v1987_v50 = vpop.eup %1986  ;;  %v1273_v1 = vmul.f32 %v1985_v49, %v1983_v33  ;;  %v1803_v33 = vpack.c.bf16 %v1528_v32, %v1527_v31  ;;  %v1529_v49 = vld [vmem:[#allocation15 + $0x30] sm:$0xff] }
 0x68a   :  { %v1272_v57 = vmul.f32 %v1987_v50, %v2795_v0  ;;  %v1989_v48 = vpop.eup %1988  ;;  %v2050_v0 = vld [vmem:[#allocation12 + $0xc0] ss:$16 sps:$4 sm:$0xff]  }
 0x68b   :  { %v1530_v50 = vld [vmem:[#allocation15 + $0x38] sm:$0xff] }
 0x68c   :  { %v2886_v59 = vadd.f32 %v1273_v1, %v1272_v57  ;;  %v1806_v1 = vpack.c.bf16 %v1530_v50, %v1529_v49  ;;  %v1532_v57 = vld [vmem:[#allocation15 + $0x48] sm:$0xff] }
 0x68e   :  { %1990 = vtanh.f32 %v2886_v59 }
 0x698   :  { %v1991_v60 = vpop.eup %1990 }
 0x699   :  { %v1276_v62 = vmul.f32 %v1991_v60, %v1989_v48  ;;  %v1809_v48 = vpack.c.bf16 %v1532_v57, %v1531_v56  ;;  %v1534_v60 = vld [vmem:[#allocation15 + $0x58] sm:$0xff] }
 0x69b   :  { %v2890_v3 = vadd.f32 %v1276_v62, %v2799_v15  ;;  %v1285_v2 = vpack.c.bf16 %v1276_v62, %v1276_v62  ;;  %v2052_v15 = vld [vmem:[#allocation12 + $0xe4] ss:$16 sps:$4 sm:$0xff]   ;;  %v2256_v62 = vmov 0.0  }
 0x69d   :  { %1319 = vmatmul.mubr.bf16.vlgmr.msra.gmra.mrb[40].mxu0 %v1285_v2  ;;  %1360 = vmatmul.mubr.bf16.vlgmr.msra.gmra.mrb[40].mxu1 %v1285_v2  ;;  %v1535_v2 = vld [vmem:[#allocation15 + $0x60] sm:$0xff] }
 0x69e   :  { %1406 = vmatpush1.bf16.msra.mxu0 %v2801_v8  ;;  %1447 = vmatpush1.bf16.msra.mxu1 %v2804_v35  ;;  %v2054_v8 = vld [vmem:[#allocation12 + $0xe0] ss:$16 sps:$4 sm:$0xff]   ;;  %v2055_v35 = vld [vmem:[#allocation12 + $0xe8] ss:$16 sps:$4 sm:$0xff]  }
 0x69f   :  { %1407 = vmatprep.subr.bf16.mxu0 %v2807_v26  ;;  %1448 = vmatprep.subr.bf16.mxu1 %v2810_v44  ;;  %v3026_v26 = vmov 0.0|0.0  }
 0x6a0   :  { %1437 = vmatprep.mubr.bf16.mxu0 %v3012_v4  ;;  %1478 = vmatprep.mubr.bf16.mxu1 %v3012_v4  ;;  %v2049_v4 = vld [vmem:[#allocation12 + $0xcc] ss:$16 sps:$4 sm:$0xff]  }
 0x6a2   :  { %1408 = vmatpush1.bf16.msra.mxu0 %v2815_v46  ;;  %1449 = vmatpush1.bf16.msra.mxu1 %v2818_v47  ;;  %v3027_v47 = vld [vmem:[#allocation38_spill] sm:$0xff] }
 0x6a3   :  { %1409 = vmatprep.subr.bf16.mxu0 %v2821_v42  ;;  %1450 = vmatprep.subr.bf16.mxu1 %v2824_v45  ;;  %v3028_v45 = vld [vmem:[#allocation39_spill] sm:$0xff] }
 0x6a6   :  { %1410 = vmatpush1.bf16.msra.mxu0 %v2827_v63  ;;  %1451 = vmatpush1.bf16.msra.mxu1 %v2830_v6 }
 0x6a7   :  { %1411 = vmatprep.subr.bf16.mxu0 %v2833_v51  ;;  %1452 = vmatprep.subr.bf16.mxu1 %v2836_v54  ;;  %v3029_v54 = vld [vmem:[#allocation40_spill] sm:$0xff] }
 0x6aa   :  { %1412 = vmatpush1.bf16.msra.mxu0 %v2839_v52  ;;  %1453 = vmatpush1.bf16.msra.mxu1 %v2842_v43  ;;  %v3030_v43 = vld [vmem:[#allocation41_spill] sm:$0xff] }
 0x6ab   :  { %1413 = vmatprep.subr.bf16.mxu0 %v2845_v58  ;;  %1454 = vmatprep.subr.bf16.mxu1 %v2848_v61 }
 0x6ae   :  { %1414 = vmatpush1.bf16.msra.mxu0 %v2851_v55  ;;  %1455 = vmatpush1.bf16.msra.mxu1 %v2854_v53 }
 0x6af   :  { %1415 = vmatprep.subr.bf16.mxu0 %v2857_v11  ;;  %1456 = vmatprep.subr.bf16.mxu1 %v2860_v12 }
 0x6b2   :  { %1416 = vmatpush1.bf16.msra.mxu0 %v2863_v13  ;;  %1457 = vmatpush1.bf16.msra.mxu1 %v2866_v14 }
 0x6b3   :  { %1417 = vmatprep.subr.bf16.mxu0 %v2869_v16  ;;  %1458 = vmatprep.subr.bf16.mxu1 %v2049_v4  ;;  %v1536_v4 = vld [vmem:[#allocation15 + $0x68] sm:$0xff] }
 0x6b6   :  { %1418 = vmatpush1.bf16.msra.mxu0 %v2050_v0  ;;  %1459 = vmatpush1.bf16.msra.mxu1 %v2051_v5  ;;  %v1815_v0 = vpack.c.bf16 %v1536_v4, %v1535_v2  ;;  %v1537_v5 = vld [vmem:[#allocation15 + $0x70] sm:$0xff] }
 0x6b7   :  { %1419 = vmatprep.subr.bf16.mxu0 %v2052_v15  ;;  %1460 = vmatprep.subr.bf16.mxu1 %v2053_v7  ;;  %v1538_v15 = vld [vmem:[#allocation15 + $0x78] sm:$0xff] }
 0x6b8   :  { %v1818_v7 = vpack.c.bf16 %v1538_v15, %v1537_v5 }
 0x6ba   :  { %1420 = vmatpush1.bf16.msra.mxu0 %v2054_v8  ;;  %1461 = vmatpush1.bf16.msra.mxu1 %v2055_v35 }
 0x6bb   :  { %1796 = vmatprep.subr.bf16.mxu0 %v3026_v26 }
 0x770   :  { %v1320_v44 = vpop.f32.mrb[40].mxu0  ;;  %v1361_v46 = vpop.f32.mrb[40].mxu1 }
 0x771   :  { %v1368_v42 = vadd.f32 %v1320_v44, %v3027_v47  ;;  %v1370_v63 = vadd.f32 %v1361_v46, %v3028_v45  ;;  %v1322_v6 = vpop.f32.mrb[41].mxu0  ;;  %v1363_v51 = vpop.f32.mrb[41].mxu1  ;;  %v3031_v44 = vld [vmem:[#allocation42_spill] sm:$0xff]  ;;  %v3032_v47 = vld [vmem:[#allocation43_spill] sm:$0xff] }
 0x772   :  { %v1369_v52 = vadd.f32 %v1322_v6, %v3029_v54  ;;  %v1371_v58 = vadd.f32 %v1363_v51, %v3030_v43  ;;  %v1324_v61 = vpop.f32.mrb[42].mxu0  ;;  %v1365_v55 = vpop.f32.mrb[42].mxu1  ;;  %v3033_v6 = vld [vmem:[#allocation44_spill] sm:$0xff]  ;;  %v3034_v54 = vld [vmem:[#allocation45_spill] sm:$0xff] }
 0x773   :  { %v1737_v53 = vmul.f32 -1.442695, %v1368_v42  ;;  %v1325_v11 = vpop.f32.mrb[43].mxu0  ;;  %v1366_v12 = vpop.f32.mrb[43].mxu1 }
 0x774   :  { %v1738_v13 = vmul.f32 -1.442695, %v1369_v52  ;;  %v1739_v14 = vmul.f32 -1.442695, %v1371_v58 }
 0x775   :  { %1992 = vpow2.f32 %v1737_v53 }
 0x776   :  { %1994 = vpow2.f32 %v1738_v13 }
 0x777   :  { %1996 = vpow2.f32 %v1739_v14 }
 0x778   :  { %1998 = vtanh.f32 %v1370_v63 }
 0x77f   :  { %v1993_v16 = vpop.eup %1992 }
 0x780   :  { %v1995_v17 = vpop.eup %1994  ;;  %v1375_v18 = vadd.f32 1.0, %v1993_v16 }
 0x781   :  { %v1381_v19 = vadd.f32 1.0, %v1995_v17  ;;  %v1997_v34 = vpop.eup %1996 }
 0x782   :  { %2000 = vrcp.f32 %v1375_v18  ;;  %v1999_v20 = vpop.eup %1998  ;;  %v1388_v22 = vadd.f32 1.0, %v1997_v34 }
 0x783   :  { %2002 = vrcp.f32 %v1381_v19 }
 0x784   :  { %2004 = vrcp.f32 %v1388_v22 }
 0x78c   :  { %v2001_v36 = vpop.eup %2000 }
 0x78d   :  { %v2003_v21 = vpop.eup %2002  ;;  %v1392_v37 = vmul.f32 %v2001_v36, %v1999_v20 }
 0x78e   :  { %v1391_v38 = vmul.f32 %v2003_v21, %v2886_v59  ;;  %v2005_v39 = vpop.eup %2004  ;;  %v1533_v59 = vld [vmem:[#allocation15 + $0x50] sm:$0xff] }
 0x790   :  { %v2923_v23 = vadd.f32 %v1392_v37, %v1391_v38 }
 0x792   :  { %2006 = vtanh.f32 %v2923_v23 }
 0x79c   :  { %v2007_v24 = vpop.eup %2006 }
 0x79d   :  { %v1395_v40 = vmul.f32 %v2007_v24, %v2005_v39 }
 0x79f   :  { %v1404_v25 = vpack.c.bf16 %v1395_v40, %v1395_v40  ;;  %v2927_v41 = vadd.f32 %v1395_v40, %v2890_v3  ;;  %v1812_v3 = vpack.c.bf16 %v1534_v60, %v1533_v59 }
 0x7a1   :  { %1438 = vmatmul.mubr.bf16.vlgmr.msra.gmra.mrb[44].mxu0 %v1404_v25  ;;  %1479 = vmatmul.mubr.bf16.vlgmr.msra.gmra.mrb[44].mxu1 %v1404_v25 }
 0x7a2   :  { %1798 = vmatpush3.bf16.msra.mxu0 %v1797_v10  ;;  %1793 = vmatprep.mubr.msk.f32.mxu0 %vm2255_vm1, %v2256_v62 }
 0x7a3   :  { %1799 = vmatprep.subr.bf16.mxu0 %v3026_v26 }
 0x7a6   :  { %1801 = vmatpush3.bf16.msra.mxu0 %v1800_v30 }
 0x7a7   :  { %1802 = vmatprep.subr.bf16.mxu0 %v3026_v26 }
 0x7aa   :  { %1804 = vmatpush3.bf16.msra.mxu0 %v1803_v33 }
 0x7ab   :  { %1805 = vmatprep.subr.bf16.mxu0 %v3026_v26 }
 0x7ae   :  { %1807 = vmatpush3.bf16.msra.mxu0 %v1806_v1 }
 0x7af   :  { %1808 = vmatprep.subr.bf16.mxu0 %v3026_v26 }
 0x7b2   :  { %1810 = vmatpush3.bf16.msra.mxu0 %v1809_v48 }
 0x7b3   :  { %1811 = vmatprep.subr.bf16.mxu0 %v3026_v26 }
 0x7b6   :  { %1813 = vmatpush3.bf16.msra.mxu0 %v1812_v3 }
 0x7b7   :  { %1814 = vmatprep.subr.bf16.mxu0 %v3026_v26 }
 0x7ba   :  { %1816 = vmatpush3.bf16.msra.mxu0 %v1815_v0 }
 0x7bb   :  { %1817 = vmatprep.subr.bf16.mxu0 %v3026_v26 }
 0x7be   :  { %1819 = vmatpush3.bf16.msra.mxu0 %v1818_v7 }
 0x874   :  { %v1439_v8 = vpop.f32.mrb[44].mxu0  ;;  %v1480_v35 = vpop.f32.mrb[44].mxu1 }
 0x875   :  { %v1487_v46 = vadd.f32 %v1439_v8, %v3031_v44  ;;  %v1489_v42 = vadd.f32 %v1480_v35, %v3032_v47  ;;  %v1441_v45 = vpop.f32.mrb[45].mxu0  ;;  %v1482_v63 = vpop.f32.mrb[45].mxu1 }
 0x876   :  { %v1488_v51 = vadd.f32 %v1441_v45, %v3033_v6  ;;  %v1490_v52 = vadd.f32 %v1482_v63, %v3034_v54  ;;  %v1443_v43 = vpop.f32.mrb[46].mxu0  ;;  %v1484_v58 = vpop.f32.mrb[46].mxu1 }
 0x877   :  { %v1740_v61 = vmul.f32 -1.442695, %v1487_v46  ;;  %v1444_v55 = vpop.f32.mrb[47].mxu0  ;;  %v1485_v53 = vpop.f32.mrb[47].mxu1 }
 0x878   :  { %v1741_v11 = vmul.f32 -1.442695, %v1488_v51  ;;  %v1742_v26 = vmul.f32 -1.442695, %v1490_v52 }
 0x879   :  { %2008 = vpow2.f32 %v1740_v61 }
 0x87a   :  { %2010 = vpow2.f32 %v1741_v11 }
 0x87b   :  { %2012 = vpow2.f32 %v1742_v26 }
 0x87c   :  { %2014 = vtanh.f32 %v1489_v42 }
 0x883   :  { %v2009_v12 = vpop.eup %2008 }
 0x884   :  { %v2011_v13 = vpop.eup %2010  ;;  %v1494_v14 = vadd.f32 1.0, %v2009_v12 }
 0x885   :  { %v1500_v16 = vadd.f32 1.0, %v2011_v13  ;;  %v2013_v17 = vpop.eup %2012 }
 0x886   :  { %2016 = vrcp.f32 %v1494_v14  ;;  %v2015_v18 = vpop.eup %2014  ;;  %v1507_v36 = vadd.f32 1.0, %v2013_v17 }
 0x887   :  { %2018 = vrcp.f32 %v1500_v16 }
 0x888   :  { %2020 = vrcp.f32 %v1507_v36 }
 0x890   :  { %v2017_v19 = vpop.eup %2016 }
 0x891   :  { %v2019_v34 = vpop.eup %2018  ;;  %v1511_v20 = vmul.f32 %v2017_v19, %v2015_v18 }
 0x892   :  { %v1510_v21 = vmul.f32 %v2019_v34, %v2923_v23  ;;  %v2021_v22 = vpop.eup %2020 }
 0x894   :  { %v1512_v37 = vadd.f32 %v1511_v20, %v1510_v21 }
 0x896   :  { %2022 = vtanh.f32 %v1512_v37  ;;  %1619 = vst [vmem:[#allocation19] sm:$0xff] %v1512_v37 }
 0x8a0   :  { %v2023_v38 = vpop.eup %2022 }
 0x8a1   :  { %v1514_v39 = vmul.f32 %v2023_v38, %v2021_v22 }
 0x8a3   :  { %v1515_v24 = vadd.f32 %v1514_v39, %v2927_v41  ;;  %1618 = vst [vmem:[#allocation17] sm:$0xff] %v1514_v39 }
 0x8a5   :  { %v1522_v40 = vmul.f32 0.125, %v1515_v24 }
 0x8a7   :  { %1794 = vmatmul.mubr.f32.vlgmr.msra.gmra.mrb[48].mxu0 %v1522_v40 }
 0x8a8   :  { %2177 = shalt.err (!%p2174_p2)
}
 0x8a9   :  { %s2178_s27 = scalar_lea.hbm %s2985_s7, 128 }
 0x8aa   :  { %p2179_p3 = scmp.ne.s32.totalorder %s2985_s7, %s2178_s27  ;;  %p2182_p4 = scmp.lt.u32.totalorder %s2178_s27, %s2985_s7 }
 0x8ac   :  { %p2184_p5 = pnand %p2182_p4, %p2179_p3 }
 0x8ae   :  { %2187 = shalt.err (!%p2184_p5)
}
 0x8af   :  { %1639 = dma.vmem_to_hbm [thread:$0]  %s1637_s22, 128, %s2985_s7, [#allocation18]  }
 0x8b0   :  { %s2258_s11 = smov [#allocation19]  }
 0x8b1   :  { %s1646_s0 = sshll.u32 %s2258_s11, 4  ;;  %s1647_s0 = int_to_ptr.vmem [resolvable:$true] %s1646_s0 }
 0x8b2   :  { %s2188_s23 = scalar_lea.vmem %s1647_s0, 128  ;;  %p2193_p7 = scmp.lt.s32.totalorder %s1647_s0, %s1647_s0 }
 0x8b3   :  { %p2189_p6 = scmp.ne.s32.totalorder %s1647_s0, %s2188_s23  ;;  %p2194_p8 = scmp.lt.s32.totalorder %s2188_s23, %s2188_s23 }
 0x8b5   :  { %p2195_p9 = por %p2194_p8, %p2193_p7 }
 0x8b7   :  { %p2196_p10 = pnand %p2195_p9, %p2189_p6 }
 0x8b9   :  { %2199 = shalt.err (!%p2196_p10)
}
 0x8ba   :  { %s2200_s14 = scalar_lea.hbm %s2986_s8, 128 }
 0x8bb   :  { %p2201_p11 = scmp.ne.s32.totalorder %s2986_s8, %s2200_s14  ;;  %p2204_p12 = scmp.lt.u32.totalorder %s2200_s14, %s2986_s8 }
 0x8bd   :  { %p2206_p13 = pnand %p2204_p12, %p2201_p11 }
 0x8bf   :  { %2209 = shalt.err (!%p2206_p13)
}
 0x8c0   :  { %1649 = dma.vmem_to_hbm [thread:$0]  %s1647_s0, 128, %s2986_s8, [#allocation18]   ;;  %v1743_v23 = vld [vmem:[#allocation6] ss:$0 sm:$0xff]  ;;  %vm1616_vm2 = vcmask 7168  }
 0x8c1   :  { %s2259_s20 = smov [#allocation16]  }
 0x8c2   :  { %s1626_s2 = sshll.u32 %s2259_s20, 4  ;;  %s1627_s2 = int_to_ptr.vmem [resolvable:$true] %s1626_s2 }
 0x8c3   :  { %s2210_s16 = scalar_lea.vmem %s1627_s2, 128  ;;  %p2215_p1 = scmp.lt.s32.totalorder %s1627_s2, %s1627_s2 }
 0x8c4   :  { %p2211_p0 = scmp.ne.s32.totalorder %s1627_s2, %s2210_s16  ;;  %p2216_p2 = scmp.lt.s32.totalorder %s2210_s16, %s2210_s16 }
 0x8c6   :  { %p2217_p3 = por %p2216_p2, %p2215_p1 }
 0x8c8   :  { %p2218_p4 = pnand %p2217_p3, %p2211_p0 }
 0x97a   :  { %v1612_v25 = vpop.f32.mrb[48].mxu0 }
 0x97b   :  { %v1613_v41 = vadd.f32 %v1743_v23, %v1612_v25  ;;  %v1795_v27 = vpop.f32.mrb[49].mxu0 }
 0x97d   :  { %1617 = vst.msk [vmem:[#allocation16] sm:$0xff] %vm1616_vm2, %v1613_v41 }
 0x97e   :  { %2221 = shalt.err (!%p2218_p4)
}
 0x97f   :  { %s2222_s8 = scalar_lea.hbm %s2984_s6, 128 }
 0x980   :  { %p2223_p5 = scmp.ne.s32.totalorder %s2984_s6, %s2222_s8  ;;  %p2226_p6 = scmp.lt.u32.totalorder %s2222_s8, %s2984_s6 }
 0x982   :  { %p2228_p7 = pnand %p2226_p6, %p2223_p5 }
 0x984   :  { %2231 = shalt.err (!%p2228_p7)
}
 0x985   :  { %1629 = dma.vmem_to_hbm [thread:$0]  %s1627_s2, 128, %s2984_s6, [#allocation9]  }
 0x986   :  { %2238 = dma.done.wait [#allocation9], 128  }
 0x987   :  { %2239 = vsyncadd [#allocation9], 4294967168 }
 0x988   :  { %2240 = dma.done.wait [#allocation18], 256  }
 0x989   :  { %2241 = vsyncadd [#allocation18], 4294967040 }
 0x98a   :  { %1659 = vsyncpa [#allocation8], 1 }
 0x98b   :  { %1660 = vsyncpa [#allocation11], 1 }
 0x98c   :  { %1661 = vsyncpa [#allocation14], 1 }
 0x98d   :  { %1662 = vsyncpa [#allocation9], 1 }
 0x98e   :  { %1663 = vsyncpa [#allocation18], 1 }

</bundles_post_ra>
